<compile_context>
chip_gen: v7x
topology: tpu7x:2x2x1
jax: 0.10.0
libtpu: 0.0.40
codegen_flags: <defaults>
</compile_context>

<pallas_src>
import jax
import jax.numpy as jnp
from jax.experimental import pallas as pl
from jax.experimental.pallas import tpu as pltpu

NUM_CLASSES = 10  # TODO(synk): original value = len(np.unique(products['GS1 Form'])) from products.csv


def _round_up(x, m):
    return ((x + m - 1) // m) * m


# ---------------------------------------------------------------------------
# Pallas kernel 1: conv-as-matmul, single K step, bias + ReLU fused.
# ---------------------------------------------------------------------------
def _conv_matmul_relu_kernel(x_ref, w_ref, b_ref, o_ref):
    acc = jnp.dot(x_ref[...], w_ref[...], preferred_element_type=jnp.float32)
    o_ref[...] = jnp.maximum(acc + b_ref[...], 0.0)


def conv_matmul_relu(patches, w_mat, b, *, tm=128):
    """relu(patches @ w_mat + b).  patches: (M, K), w_mat: (K, N) -> (M, N) f32.

    K is kept as one full block (padded only to a multiple of 32, not 128);
    N is lane-padded to 128 so stores are lane-dense.
    """
    M, K = patches.shape
    Kw, N = w_mat.shape
    assert K == Kw
    pM = _round_up(M, tm)
    pK = _round_up(K, 32)      # sublane alignment only; NOT padded to 128
    pN = _round_up(N, 128)     # lane-dense output stores

    xp = jnp.pad(patches.astype(jnp.bfloat16), ((0, pM - M), (0, pK - K)))
    wp = jnp.pad(w_mat.astype(jnp.bfloat16), ((0, pK - K), (0, pN - N)))
    bp = jnp.pad(b.astype(jnp.float32), (0, pN - N)).reshape(1, pN)

    out = pl.pallas_call(
        _conv_matmul_relu_kernel,
        out_shape=jax.ShapeDtypeStruct((pM, pN), jnp.float32),
        grid_spec=pltpu.PrefetchScalarGridSpec(
            num_scalar_prefetch=0,
            grid=(pM // tm, pN // 128),
            in_specs=[
                pl.BlockSpec((tm, pK), lambda i, j: (i, 0)),
                pl.BlockSpec((pK, 128), lambda i, j: (0, j)),
                pl.BlockSpec((1, 128), lambda i, j: (0, j)),
            ],
            out_specs=pl.BlockSpec((tm, 128), lambda i, j: (i, j)),
        ),
        compiler_params=pltpu.CompilerParams(
            dimension_semantics=("parallel", "parallel")
        ),
    )(xp, wp, bp)
    return out[:M, :N]


# ---------------------------------------------------------------------------
# Pallas kernel 2: fused fc1 (K-reduction, ReLU) + fc2 epilogue.
# ---------------------------------------------------------------------------
def _fc_fused_kernel(x_ref, w1_ref, b1_ref, w2_ref, b2_ref, o_ref, acc_ref):
    k = pl.program_id(0)

    @pl.when(k == 0)
    def _():
        acc_ref[...] = jnp.zeros_like(acc_ref)

    acc_ref[...] += jnp.dot(
        x_ref[...], w1_ref[...], preferred_element_type=jnp.float32
    )

    @pl.when(k == pl.num_programs(0) - 1)
    def _():
        h = jnp.maximum(acc_ref[...] + b1_ref[...], 0.0)           # fc1 + ReLU
        o_ref[...] = (
            jnp.dot(h.astype(w2_ref.dtype), w2_ref[...],
                    preferred_element_type=jnp.float32)
            + b2_ref[...]                                          # fc2
        )


def fc1_fc2_fused(x, w1, b1, w2, b2, *, tk=3584):
    """out = (relu(x @ w1 + b1)) @ w2 + b2, as a single Pallas call.

    x: (B, K) with K = 50176; w1: (K, 128); w2: (128, num_classes).
    """
    M, K = x.shape
    K1, H = w1.shape
    H2, N = w2.shape
    assert K == K1 and H == H2
    assert H % 128 == 0, "fc1 hidden width must be a multiple of 128"

    pM = _round_up(max(M, 16), 16)   # tiny: do NOT pad batch to 128
    pK = _round_up(K, tk)            # 50176 % 3584 == 0 -> no actual pad
    pN = _round_up(N, 128)           # lane-dense logits slab

    xp = jnp.pad(x.astype(jnp.bfloat16), ((0, pM - M), (0, pK - K)))
    w1p = jnp.pad(w1.astype(jnp.bfloat16), ((0, pK - K), (0, 0)))
    b1p = b1.astype(jnp.float32).reshape(1, H)
    w2p = jnp.pad(w2.astype(jnp.bfloat16), ((0, 0), (0, pN - N)))
    b2p = jnp.pad(b2.astype(jnp.float32), (0, pN - N)).reshape(1, pN)

    out = pl.pallas_call(
        _fc_fused_kernel,
        out_shape=jax.ShapeDtypeStruct((pM, pN), jnp.float32),
        grid_spec=pltpu.PrefetchScalarGridSpec(
            num_scalar_prefetch=0,
            grid=(pK // tk,),
            in_specs=[
                pl.BlockSpec((pM, tk), lambda k: (0, k)),
                pl.BlockSpec((tk, H), lambda k: (k, 0)),
                pl.BlockSpec((1, H), lambda k: (0, 0)),
                pl.BlockSpec((H, pN), lambda k: (0, 0)),
                pl.BlockSpec((1, pN), lambda k: (0, 0)),
            ],
            out_specs=pl.BlockSpec((pM, pN), lambda k: (0, 0)),
            scratch_shapes=[pltpu.VMEM((pM, H), jnp.float32)],
        ),
        compiler_params=pltpu.CompilerParams(
            dimension_semantics=("arbitrary",)
        ),
    )(xp, w1p, b1p, w2p, b2p)
    return out[:M, :N]


# ---------------------------------------------------------------------------
# Convolution = im2col (JAX glue) + Pallas matmul kernel.
# ---------------------------------------------------------------------------
def conv2d_relu(x_nhwc, w_mat, b, *, kh=3, kw=3):
    """Valid (stride 1) conv + ReLU.  w_mat pre-reshaped to (KH*KW*IC, OC)."""
    B, H, W, C = x_nhwc.shape
    OH, OW = H - kh + 1, W - kw + 1
    x_bf = x_nhwc.astype(jnp.bfloat16)
    cols = [x_bf[:, i:i + OH, j:j + OW, :] for i in range(kh) for j in range(kw)]
    patches = jnp.concatenate(cols, axis=-1).reshape(B * OH * OW, kh * kw * C)
    out = conv_matmul_relu(patches, w_mat, b)
    return out.reshape(B, OH, OW, -1)


# ---------------------------------------------------------------------------
# Parameters (deterministic, synthetic; PyTorch layouts) and kernel-side prep.
# ---------------------------------------------------------------------------
def init_params(key):
    ks = jax.random.split(key, 8)

    def init(k, shape, fan_in):
        bound = 1.0 / jnp.sqrt(fan_in)
        return jax.random.uniform(k, shape, jnp.float32, -bound, bound)

    return {
        "conv1_w": init(ks[0], (32, 3, 3, 3), 3 * 3 * 3),
        "conv1_b": init(ks[1], (32,), 3 * 3 * 3),
        "conv2_w": init(ks[2], (64, 32, 3, 3), 32 * 3 * 3),
        "conv2_b": init(ks[3], (64,), 32 * 3 * 3),
        "fc1_w": init(ks[4], (50176, 128), 50176),   # stored as (in, out)
        "fc1_b": init(ks[5], (128,), 50176),
        "fc2_w": init(ks[6], (128, NUM_CLASSES), 128),
        "fc2_b": init(ks[7], (128,), 128)[:NUM_CLASSES],
    }


def prepare_params(p):
    """One-time layout transforms + bf16 casts (zero runtime cost per forward)."""
    def conv_wm(w_pt):  # (OC, IC, KH, KW) -> (KH*KW*IC, OC), matching patch layout
        OC, IC, KH, KW = w_pt.shape
        return jnp.transpose(w_pt, (2, 3, 1, 0)).reshape(KH * KW * IC, OC).astype(jnp.bfloat16)

    # Fold the NCHW-flatten (x.view(B,-1)) row order into fc1's weight so the
    # runtime flatten of the NHWC conv2 output is a plain contiguous reshape.
    C, H, W = 64, 28, 28
    fc1_w = jnp.transpose(p["fc1_w"].reshape(C, H, W, -1), (1, 2, 0, 3)).reshape(C * H * W, -1)

    return {
        "conv1_w": conv_wm(p["conv1_w"]), "conv1_b": p["conv1_b"],
        "conv2_w": conv_wm(p["conv2_w"]), "conv2_b": p["conv2_b"],
        "fc1_w": fc1_w.astype(jnp.bfloat16), "fc1_b": p["fc1_b"],
        "fc2_w": p["fc2_w"].astype(jnp.bfloat16), "fc2_b": p["fc2_b"],
    }


# ---------------------------------------------------------------------------
# Forward pass (Pallas) and plain-JAX reference (same bf16/f32-acc policy).
# ---------------------------------------------------------------------------
def cnn_forward(x_nchw, prep):
    x = jnp.transpose(x_nchw, (0, 2, 3, 1))                                # NCHW -> NHWC
    h = conv2d_relu(x, prep["conv1_w"], prep["conv1_b"])                   # (B,30,30,32)
    h = conv2d_relu(h, prep["conv2_w"], prep["conv2_b"])                   # (B,28,28,64)
    B = h.shape[0]
    h = h.reshape(B, -1)            # NHWC flatten; fc1_w rows already permuted to match
    return fc1_fc2_fused(h, prep["fc1_w"], prep["fc1_b"],
                         prep["fc2_w"], prep["fc2_b"])                     # (B, NUM_CLASSES)


def cnn_reference(x_nchw, params):
    """Plain-JAX reference implementing the original module semantics with the
    same bf16-input / f32-accumulate precision policy as the kernels."""
    x = jnp.transpose(x_nchw, (0, 2, 3, 1)).astype(jnp.bfloat16)

    def conv(x_bf, w_pt, b):
        y = jax.lax.conv_general_dilated(
            x_bf, jnp.transpose(w_pt, (2, 3, 1, 0)).astype(jnp.bfloat16),
            window_strides=(1, 1), padding="VALID",
            dimension_numbers=("NHWC", "HWIO", "NHWC"),
            preferred_element_type=jnp.float32,
        )
        return jax.nn.relu(y + b)

    h = conv(x, params["conv1_w"], params["conv1_b"])
    h = conv(h.astype(jnp.bfloat16), params["conv2_w"], params["conv2_b"])
    B = h.shape[0]
    h = jnp.transpose(h, (0, 3, 1, 2)).reshape(B, -1)     # original NCHW flatten order
    h = jax.nn.relu(
        jnp.dot(h.astype(jnp.bfloat16), params["fc1_w"].astype(jnp.bfloat16),
                preferred_element_type=jnp.float32) + params["fc1_b"])
    return (jnp.dot(h.astype(jnp.bfloat16), params["fc2_w"].astype(jnp.bfloat16),
                    preferred_element_type=jnp.float32) + params["fc2_b"])


if __name__ == "__main__":
    key = jax.random.PRNGKey(0)
    k_in, k_par = jax.random.split(key)

    # Input shape forced by fc1 (50176 = 64*28*28): (B, 3, 32, 32). Small batch.
    x = jax.random.normal(k_in, (2, 3, 32, 32), jnp.float32)
    params = init_params(k_par)
    prep = prepare_params(params)

    fwd = jax.jit(cnn_forward)
    out = jax.block_until_ready(fwd(x, prep))
    assert out.shape == (2, NUM_CLASSES), out.shape

    ref = jax.block_until_ready(cnn_reference(x, params))
    max_err = float(jnp.max(jnp.abs(out - ref)))
    assert jnp.allclose(out, ref, atol=5e-3, rtol=5e-3), max_err

    print("KERNEL_OK")
</pallas_src>

<mosaic_0001>
module attributes {stable_mosaic.version = 11 : i64} {
  func.func @_conv_matmul_relu_kernel(%arg0: i32, %arg1: i32, %arg2: memref<128x32xbf16, #tpu.memory_space<vmem>>, %arg3: memref<32x128xbf16, #tpu.memory_space<vmem>>, %arg4: memref<1x128xf32, #tpu.memory_space<vmem>>, %arg5: memref<128x128xf32, #tpu.memory_space<vmem>>) attributes {dimension_semantics = [#tpu.dimension_semantics<parallel>, #tpu.dimension_semantics<parallel>], iteration_bounds = array<i64: 15, 1>, scalar_prefetch = 0 : i64, scratch_operands = 0 : i64, tpu.core_type = #tpu.core_type<tc>, window_params = [{transform_indices = @transform_0, window_bounds = array<i64: 128, 32>}, {transform_indices = @transform_1, window_bounds = array<i64: 32, 128>}, {transform_indices = @transform_2, window_bounds = array<i64: 1, 128>}, {transform_indices = @transform_3, window_bounds = array<i64: 128, 128>}]} {
    %c0 = arith.constant 0 : index
    %c0_0 = arith.constant 0 : index
    %0 = vector.load %arg2[%c0, %c0_0] : memref<128x32xbf16, #tpu.memory_space<vmem>>, vector<128x32xbf16>
    %c0_1 = arith.constant 0 : index
    %c0_2 = arith.constant 0 : index
    %1 = vector.load %arg3[%c0_1, %c0_2] : memref<32x128xbf16, #tpu.memory_space<vmem>>, vector<32x128xbf16>
    %cst = arith.constant dense<0.000000e+00> : vector<128x128xf32>
    %2 = tpu.matmul %0, %1, %cst {dimension_numbers = #tpu.dot_dimension_numbers<[1], [0], [0], [1], [0, 0, 1, 1], [], []>} : vector<128x32xbf16>, vector<32x128xbf16>, vector<128x128xf32> -> vector<128x128xf32>
    %c0_3 = arith.constant 0 : index
    %c0_4 = arith.constant 0 : index
    %3 = vector.load %arg4[%c0_3, %c0_4] : memref<1x128xf32, #tpu.memory_space<vmem>>, vector<1x128xf32>
    %4 = vector.broadcast %3 : vector<1x128xf32> to vector<128x128xf32>
    %5 = arith.addf %2, %4 : vector<128x128xf32>
    %cst_5 = arith.constant 0.000000e+00 : f32
    %6 = vector.broadcast %cst_5 : f32 to vector<128x128xf32>
    %7 = arith.maximumf %5, %6 : vector<128x128xf32>
    %c0_6 = arith.constant 0 : index
    %c0_7 = arith.constant 0 : index
    %8 = vector.load %arg5[%c0_6, %c0_7] : memref<128x128xf32, #tpu.memory_space<vmem>>, vector<128x128xf32>
    tpu.vector_store %arg5[%c0_6, %c0_7], %7 {strides = array<i32>} : memref<128x128xf32, #tpu.memory_space<vmem>>, vector<128x128xf32>,
    return
  }
  func.func @transform_0(%arg0: i32, %arg1: i32) -> (i32, i32) {
    %c0_i32 = arith.constant 0 : i32
    %c0_i32_0 = arith.constant 0 : i32
    return %arg0, %c0_i32 : i32, i32
  }
  func.func @transform_1(%arg0: i32, %arg1: i32) -> (i32, i32) {
    %c0_i32 = arith.constant 0 : i32
    %c0_i32_0 = arith.constant 0 : i32
    return %c0_i32, %arg1 : i32, i32
  }
  func.func @transform_2(%arg0: i32, %arg1: i32) -> (i32, i32) {
    %c0_i32 = arith.constant 0 : i32
    %c0_i32_0 = arith.constant 0 : i32
    return %c0_i32, %arg1 : i32, i32
  }
  func.func @transform_3(%arg0: i32, %arg1: i32) -> (i32, i32) {
    %c0_i32 = arith.constant 0 : i32
    return %arg0, %arg1 : i32, i32
  }
}

module attributes {stable_mosaic.version = 11 : i64} {
  func.func @_conv_matmul_relu_kernel(%arg0: i32, %arg1: i32, %arg2: memref<128x288xbf16, #tpu.memory_space<vmem>>, %arg3: memref<288x128xbf16, #tpu.memory_space<vmem>>, %arg4: memref<1x128xf32, #tpu.memory_space<vmem>>, %arg5: memref<128x128xf32, #tpu.memory_space<vmem>>) attributes {dimension_semantics = [#tpu.dimension_semantics<parallel>, #tpu.dimension_semantics<parallel>], iteration_bounds = array<i64: 13, 1>, scalar_prefetch = 0 : i64, scratch_operands = 0 : i64, tpu.core_type = #tpu.core_type<tc>, window_params = [{transform_indices = @transform_0, window_bounds = array<i64: 128, 288>}, {transform_indices = @transform_1, window_bounds = array<i64: 288, 128>}, {transform_indices = @transform_2, window_bounds = array<i64: 1, 128>}, {transform_indices = @transform_3, window_bounds = array<i64: 128, 128>}]} {
    %c0 = arith.constant 0 : index
    %c0_0 = arith.constant 0 : index
    %0 = vector.load %arg2[%c0, %c0_0] : memref<128x288xbf16, #tpu.memory_space<vmem>>, vector<128x288xbf16>
    %c0_1 = arith.constant 0 : index
    %c0_2 = arith.constant 0 : index
    %1 = vector.load %arg3[%c0_1, %c0_2] : memref<288x128xbf16, #tpu.memory_space<vmem>>, vector<288x128xbf16>
    %cst = arith.constant dense<0.000000e+00> : vector<128x128xf32>
    %2 = tpu.matmul %0, %1, %cst {dimension_numbers = #tpu.dot_dimension_numbers<[1], [0], [0], [1], [0, 0, 1, 1], [], []>} : vector<128x288xbf16>, vector<288x128xbf16>, vector<128x128xf32> -> vector<128x128xf32>
    %c0_3 = arith.constant 0 : index
    %c0_4 = arith.constant 0 : index
    %3 = vector.load %arg4[%c0_3, %c0_4] : memref<1x128xf32, #tpu.memory_space<vmem>>, vector<1x128xf32>
    %4 = vector.broadcast %3 : vector<1x128xf32> to vector<128x128xf32>
    %5 = arith.addf %2, %4 : vector<128x128xf32>
    %cst_5 = arith.constant 0.000000e+00 : f32
    %6 = vector.broadcast %cst_5 : f32 to vector<128x128xf32>
    %7 = arith.maximumf %5, %6 : vector<128x128xf32>
    %c0_6 = arith.constant 0 : index
    %c0_7 = arith.constant 0 : index
    %8 = vector.load %arg5[%c0_6, %c0_7] : memref<128x128xf32, #tpu.memory_space<vmem>>, vector<128x128xf32>
    tpu.vector_store %arg5[%c0_6, %c0_7], %7 {strides = array<i32>} : memref<128x128xf32, #tpu.memory_space<vmem>>, vector<128x128xf32>,
    return
  }
  func.func @transform_0(%arg0: i32, %arg1: i32) -> (i32, i32) {
    %c0_i32 = arith.constant 0 : i32
    %c0_i32_0 = arith.constant 0 : i32
    return %arg0, %c0_i32 : i32, i32
  }
  func.func @transform_1(%arg0: i32, %arg1: i32) -> (i32, i32) {
    %c0_i32 = arith.constant 0 : i32
    %c0_i32_0 = arith.constant 0 : i32
    return %c0_i32, %arg1 : i32, i32
  }
  func.func @transform_2(%arg0: i32, %arg1: i32) -> (i32, i32) {
    %c0_i32 = arith.constant 0 : i32
    %c0_i32_0 = arith.constant 0 : i32
    return %c0_i32, %arg1 : i32, i32
  }
  func.func @transform_3(%arg0: i32, %arg1: i32) -> (i32, i32) {
    %c0_i32 = arith.constant 0 : i32
    return %arg0, %arg1 : i32, i32
  }
}

module attributes {stable_mosaic.version = 11 : i64} {
  func.func @_fc_fused_kernel(%arg0: i32, %arg1: memref<16x3584xbf16, #tpu.memory_space<vmem>>, %arg2: memref<3584x128xbf16, #tpu.memory_space<vmem>>, %arg3: memref<1x128xf32, #tpu.memory_space<vmem>>, %arg4: memref<128x128xbf16, #tpu.memory_space<vmem>>, %arg5: memref<1x128xf32, #tpu.memory_space<vmem>>, %arg6: memref<16x128xf32, #tpu.memory_space<vmem>>, %arg7: memref<16x128xf32, #tpu.memory_space<vmem>>) attributes {dimension_semantics = [#tpu.dimension_semantics<arbitrary>], iteration_bounds = array<i64: 14>, scalar_prefetch = 0 : i64, scratch_operands = 1 : i64, tpu.core_type = #tpu.core_type<tc>, window_params = [{transform_indices = @transform_0, window_bounds = array<i64: 16, 3584>}, {transform_indices = @transform_1, window_bounds = array<i64: 3584, 128>}, {pipeline_mode = #tpu.pipeline_mode<synchronous>, transform_indices = @transform_2, window_bounds = array<i64: 1, 128>}, {pipeline_mode = #tpu.pipeline_mode<synchronous>, transform_indices = @transform_3, window_bounds = array<i64: 128, 128>}, {pipeline_mode = #tpu.pipeline_mode<synchronous>, transform_indices = @transform_4, window_bounds = array<i64: 1, 128>}, {pipeline_mode = #tpu.pipeline_mode<synchronous>, transform_indices = @transform_5, window_bounds = array<i64: 16, 128>}]} {
    %c0_i32 = arith.constant 0 : i32
    %0 = arith.cmpi eq, %arg0, %c0_i32 : i32
    %1 = arith.extui %0 : i1 to i32
    %c0_i32_0 = arith.constant 0 : i32
    %2 = arith.cmpi ne, %1, %c0_i32_0 : i32
    scf.if %2 {
      %cst_9 = arith.constant 0.000000e+00 : f32
      %12 = vector.broadcast %cst_9 : f32 to vector<16x128xf32>
      %c0_10 = arith.constant 0 : index
      %c0_11 = arith.constant 0 : index
      %13 = vector.load %arg7[%c0_10, %c0_11] : memref<16x128xf32, #tpu.memory_space<vmem>>, vector<16x128xf32>
      tpu.vector_store %arg7[%c0_10, %c0_11], %12 {strides = array<i32>} : memref<16x128xf32, #tpu.memory_space<vmem>>, vector<16x128xf32>,
    } else {
    }
    %c0 = arith.constant 0 : index
    %c0_1 = arith.constant 0 : index
    %3 = vector.load %arg7[%c0, %c0_1] : memref<16x128xf32, #tpu.memory_space<vmem>>, vector<16x128xf32>
    %c0_2 = arith.constant 0 : index
    %c0_3 = arith.constant 0 : index
    %4 = vector.load %arg1[%c0_2, %c0_3] : memref<16x3584xbf16, #tpu.memory_space<vmem>>, vector<16x3584xbf16>
    %c0_4 = arith.constant 0 : index
    %c0_5 = arith.constant 0 : index
    %5 = vector.load %arg2[%c0_4, %c0_5] : memref<3584x128xbf16, #tpu.memory_space<vmem>>, vector<3584x128xbf16>
    %cst = arith.constant dense<0.000000e+00> : vector<16x128xf32>
    %6 = tpu.matmul %4, %5, %cst {dimension_numbers = #tpu.dot_dimension_numbers<[1], [0], [0], [1], [0, 0, 1, 1], [], []>} : vector<16x3584xbf16>, vector<3584x128xbf16>, vector<16x128xf32> -> vector<16x128xf32>
    %7 = arith.addf %3, %6 : vector<16x128xf32>
    %c0_6 = arith.constant 0 : index
    %c0_7 = arith.constant 0 : index
    %8 = vector.load %arg7[%c0_6, %c0_7] : memref<16x128xf32, #tpu.memory_space<vmem>>, vector<16x128xf32>
    tpu.vector_store %arg7[%c0_6, %c0_7], %7 {strides = array<i32>} : memref<16x128xf32, #tpu.memory_space<vmem>>, vector<16x128xf32>,
    %c13_i32 = arith.constant 13 : i32
    %9 = arith.cmpi eq, %arg0, %c13_i32 : i32
    %10 = arith.extui %9 : i1 to i32
    %c0_i32_8 = arith.constant 0 : i32
    %11 = arith.cmpi ne, %10, %c0_i32_8 : i32
    scf.if %11 {
      %c0_9 = arith.constant 0 : index
      %c0_10 = arith.constant 0 : index
      %12 = vector.load %arg7[%c0_9, %c0_10] : memref<16x128xf32, #tpu.memory_space<vmem>>, vector<16x128xf32>
      %c0_11 = arith.constant 0 : index
      %c0_12 = arith.constant 0 : index
      %13 = vector.load %arg3[%c0_11, %c0_12] : memref<1x128xf32, #tpu.memory_space<vmem>>, vector<1x128xf32>
      %14 = vector.broadcast %13 : vector<1x128xf32> to vector<16x128xf32>
      %15 = arith.addf %12, %14 : vector<16x128xf32>
      %cst_13 = arith.constant 0.000000e+00 : f32
      %16 = vector.broadcast %cst_13 : f32 to vector<16x128xf32>
      %17 = arith.maximumf %15, %16 : vector<16x128xf32>
      %18 = arith.truncf %17 : vector<16x128xf32> to vector<16x128xbf16>
      %c0_14 = arith.constant 0 : index
      %c0_15 = arith.constant 0 : index
      %19 = vector.load %arg4[%c0_14, %c0_15] : memref<128x128xbf16, #tpu.memory_space<vmem>>, vector<128x128xbf16>
      %cst_16 = arith.constant dense<0.000000e+00> : vector<16x128xf32>
      %20 = tpu.matmul %18, %19, %cst_16 {dimension_numbers = #tpu.dot_dimension_numbers<[1], [0], [0], [1], [0, 0, 1, 1], [], []>} : vector<16x128xbf16>, vector<128x128xbf16>, vector<16x128xf32> -> vector<16x128xf32>
      %c0_17 = arith.constant 0 : index
      %c0_18 = arith.constant 0 : index
      %21 = vector.load %arg5[%c0_17, %c0_18] : memref<1x128xf32, #tpu.memory_space<vmem>>, vector<1x128xf32>
      %22 = vector.broadcast %21 : vector<1x128xf32> to vector<16x128xf32>
      %23 = arith.addf %20, %22 : vector<16x128xf32>
      %c0_19 = arith.constant 0 : index
      %c0_20 = arith.constant 0 : index
      %24 = vector.load %arg6[%c0_19, %c0_20] : memref<16x128xf32, #tpu.memory_space<vmem>>, vector<16x128xf32>
      tpu.vector_store %arg6[%c0_19, %c0_20], %23 {strides = array<i32>} : memref<16x128xf32, #tpu.memory_space<vmem>>, vector<16x128xf32>,
    } else {
    }
    return
  }
  func.func @transform_0(%arg0: i32) -> (i32, i32) {
    %c0_i32 = arith.constant 0 : i32
    %c0_i32_0 = arith.constant 0 : i32
    return %c0_i32, %arg0 : i32, i32
  }
  func.func @transform_1(%arg0: i32) -> (i32, i32) {
    %c0_i32 = arith.constant 0 : i32
    %c0_i32_0 = arith.constant 0 : i32
    return %arg0, %c0_i32 : i32, i32
  }
  func.func @transform_2(%arg0: i32) -> (i32, i32) {
    %c0_i32 = arith.constant 0 : i32
    %c0_i32_0 = arith.constant 0 : i32
    %c0_i32_1 = arith.constant 0 : i32
    return %c0_i32, %c0_i32_0 : i32, i32
  }
  func.func @transform_3(%arg0: i32) -> (i32, i32) {
    %c0_i32 = arith.constant 0 : i32
    %c0_i32_0 = arith.constant 0 : i32
    %c0_i32_1 = arith.constant 0 : i32
    return %c0_i32, %c0_i32_0 : i32, i32
  }
  func.func @transform_4(%arg0: i32) -> (i32, i32) {
    %c0_i32 = arith.constant 0 : i32
    %c0_i32_0 = arith.constant 0 : i32
    %c0_i32_1 = arith.constant 0 : i32
    return %c0_i32, %c0_i32_0 : i32, i32
  }
  func.func @transform_5(%arg0: i32) -> (i32, i32) {
    %c0_i32 = arith.constant 0 : i32
    %c0_i32_0 = arith.constant 0 : i32
    %c0_i32_1 = arith.constant 0 : i32
    return %c0_i32, %c0_i32_0 : i32, i32
  }
}

</mosaic_0001>

<bundles_post_ra>
// kernel: cnn_forward.3
= control target key start
LH: loop header
LB: loop body
LE: loop exit
PB: predicated region body
PF: predicated region fallthrough
CT: control target
= control target key end

     0   :  { %s705_s12 = smov 0   ;;  %s707_s13 = smov 0   ;;  %s777_s0 = inlined_call_operand.vmem [shape: bf16[1920,32], index: 0, kind: input, shape index: {}]   ;;  %s778_s1 = inlined_call_operand.vmem [shape: bf16[32,128], index: 1, kind: input, shape index: {}]   ;;  %s779_s2 = inlined_call_operand.vmem [shape: f32[1,128], index: 2, kind: input, shape index: {}]   ;;  %s780_s3 = inlined_call_operand.vmem [shape: f32[1920,128], index: 3, kind: output, shape index: {}]  }
   0x1   :  { %s709_s14 = smov 0  }
   0x2 LB: > { %s25_s15 = sadd.s32 1, %s679_s13  ;;  %p567_p0 = scmp.ge.s32.totalorder %s683_s14, 1  ;;  %s683_s14 = sphi %s709_s14, %s13_s14   ;;  %s679_s13 = sphi %s707_s13, %s782_s13   ;;  %s675_s12 = sphi %s705_s12, %s781_s12  }
   0x3   : > { %p27_p1 = scmp.ge.s32.totalorder %s25_s15, 15  ;;  %p169_p2 = scmp.lt.s32.totalorder %s683_s14, 16 }
   0x5   : > { %s784_s15 = smov (%p27_p1, %s25_s15), 0  ;;  %p170_p3 = pnand %p567_p0, %p169_p2 }
   0x6   : > { %v651_v0 = vld [vmem:[%s778_s1] sm:$0xff] (!%p170_p3)   ;;  %s568_s18 = sshll.u32 (!%p170_p3), %s675_s12, 4  ;;  %v652_v1 = vld [vmem:[%s778_s1 + $0x8] sm:$0xff] (!%p170_p3)   ;;  %vm305_vm0 = vcmask (!%p170_p3), 261120  }
   0x7   : > { %173 = sbr.rel (%p170_p3) target bundleno = 248 (0xf8), region = 32  ;;  %p204_p4 = scmp.lt.s32.totalorder (!%p170_p3), %s568_s18, 239  ;;  %603 = vmatprep.subr.bf16.mxu0 (!%p170_p3), %v651_v0  ;;  %623 = vmatprep.subr.bf16.mxu1 (!%p170_p3), %v651_v0  ;;  %v572_v10 = vld [vmem:[%s779_s2] ss:$0 sm:$0xff] (!%p170_p3) }
   0x8   : > { %604 = vmatpush3.bf16.msra.mxu0 (!%p170_p3), %v651_v0  ;;  %625 = vmatpush3.bf16.msra.mxu1 (!%p170_p3), %v651_v0 }
   0x9   : > { %605 = vmatprep.subr.bf16.mxu0 (!%p170_p3), %v652_v1  ;;  %624 = vmatprep.subr.bf16.mxu1 (!%p170_p3), %v652_v1 }
   0xc   : > { %606 = vmatpush3.bf16.msra.mxu0 (!%p170_p3), %v652_v1  ;;  %626 = vmatpush3.bf16.msra.mxu1 (!%p170_p3), %v652_v1 }
   0xe   : > { %s786_s18 = smov (!%p204_p4, %s568_s18), 239 }
   0xf   : > { %s569_s21 = sshll.u32 %s786_s18, 2  ;;  %s571_s27 = sshll.u32 %s786_s18, 3 }
  0x10   : > { %s207_s24 = scalar_lea.vmem %s777_s0, %s569_s21  ;;  %s750_s30 = scalar_lea.vmem %s780_s3, %s571_s27 }
  0x11   : > { %v653_v2 = vld [vmem:[%s207_s24] sm:$0xff]   ;;  %v655_v4 = vld [vmem:[%s207_s24 + $0x8] sm:$0xff]   ;;  %v657_v6 = vld [vmem:[%s207_s24 + $0x10] sm:$0xff]  }
  0x12   : > { %v654_v3 = vld [vmem:[%s207_s24 + $0x20] sm:$0xff]   ;;  %607 = vmatprep.mubr.msk.bf16.mxu0 %vm305_vm0, %v653_v2  ;;  %v656_v5 = vld [vmem:[%s207_s24 + $0x28] sm:$0xff]   ;;  %v658_v7 = vld [vmem:[%s207_s24 + $0x30] sm:$0xff]  }
  0x13   : > { %615 = vmatprep.mubr.msk.bf16.mxu1 %vm305_vm0, %v654_v3  ;;  %608 = vmatmul.mubr.msk.bf16.vlgmr.msra.gmra.mrb[0].mxu0 %vm305_vm0, %v655_v4  ;;  %v659_v8 = vld [vmem:[%s207_s24 + $0x18] sm:$0xff]  }
  0x14   : > { %616 = vmatmul.mubr.msk.bf16.vlgmr.msra.gmra.mrb[0].mxu1 %vm305_vm0, %v656_v5  ;;  %611 = vmatprep.mubr.msk.bf16.mxu0 %vm305_vm0, %v657_v6  ;;  %v660_v9 = vld [vmem:[%s207_s24 + $0x38] sm:$0xff]  }
  0x15   : > { %619 = vmatprep.mubr.msk.bf16.mxu1 %vm305_vm0, %v658_v7 }
  0x1b   : > { %612 = vmatmul.mubr.msk.bf16.gmra.mrb[4].mxu0 %vm305_vm0, %v659_v8 }
  0x1c   : > { %620 = vmatmul.mubr.msk.bf16.gmra.mrb[4].mxu1 %vm305_vm0, %v660_v9 }
  0xe6   : > { %v609_v11 = vpop.f32.mrb[0].mxu0 }
  0xe7   : > { %v373_v12 = vadd.f32 %v609_v11, %v572_v10  ;;  %v617_v13 = vpop.f32.mrb[0].mxu1  ;;  %v364_v14 = vpop.f32.mrb[1].mxu0 }
  0xe8   : > { %v405_v15 = vadd.f32 %v617_v13, %v572_v10  ;;  %v365_v16 = vadd.f32 %v572_v10, %v364_v14  ;;  %v396_v17 = vpop.f32.mrb[1].mxu1  ;;  %v610_v18 = vpop.f32.mrb[2].mxu0 }
  0xe9   : > { %v429_v19 = vmax.f32 %v373_v12, 0.0  ;;  %v397_v20 = vadd.f32 %v572_v10, %v396_v17  ;;  %v376_v21 = vadd.f32 %v610_v18, %v572_v10  ;;  %v618_v22 = vpop.f32.mrb[2].mxu1  ;;  %v367_v23 = vpop.f32.mrb[3].mxu0 }
  0xea   : > { %v437_v24 = vmax.f32 %v405_v15, 0.0  ;;  %v427_v25 = vmax.f32 %v365_v16, 0.0  ;;  %v408_v26 = vadd.f32 %v618_v22, %v572_v10  ;;  %v368_v27 = vadd.f32 %v572_v10, %v367_v23  ;;  %v399_v28 = vpop.f32.mrb[3].mxu1 }
  0xeb   : > { %445 = vst [vmem:[%s750_s30 + $0x10] sm:$0xff] %v429_v19  ;;  %v435_v29 = vmax.f32 %v397_v20, 0.0  ;;  %v430_v30 = vmax.f32 %v376_v21, 0.0  ;;  %v400_v31 = vadd.f32 %v572_v10, %v399_v28 }
  0xec   : > { %453 = vst [vmem:[%s750_s30 + $0x50] sm:$0xff] %v437_v24  ;;  %443 = vst [vmem:[%s750_s30] sm:$0xff] %v427_v25  ;;  %v438_v32 = vmax.f32 %v408_v26, 0.0  ;;  %v428_v33 = vmax.f32 %v368_v27, 0.0 }
  0xed   : > { %451 = vst [vmem:[%s750_s30 + $0x40] sm:$0xff] %v435_v29  ;;  %446 = vst [vmem:[%s750_s30 + $0x18] sm:$0xff] %v430_v30  ;;  %v436_v34 = vmax.f32 %v400_v31, 0.0 }
  0xee   : > { %454 = vst [vmem:[%s750_s30 + $0x58] sm:$0xff] %v438_v32  ;;  %444 = vst [vmem:[%s750_s30 + $0x8] sm:$0xff] %v428_v33  ;;  %v613_v35 = vpop.f32.mrb[4].mxu0 }
  0xef   : > { %452 = vst [vmem:[%s750_s30 + $0x48] sm:$0xff] %v436_v34  ;;  %v389_v36 = vadd.f32 %v613_v35, %v572_v10  ;;  %v621_v37 = vpop.f32.mrb[4].mxu1  ;;  %v380_v38 = vpop.f32.mrb[5].mxu0 }
  0xf0   : > { %v421_v39 = vadd.f32 %v621_v37, %v572_v10  ;;  %v381_v40 = vadd.f32 %v572_v10, %v380_v38  ;;  %v412_v41 = vpop.f32.mrb[5].mxu1  ;;  %v614_v42 = vpop.f32.mrb[6].mxu0 }
  0xf1   : > { %v433_v43 = vmax.f32 %v389_v36, 0.0  ;;  %v413_v44 = vadd.f32 %v572_v10, %v412_v41  ;;  %v392_v45 = vadd.f32 %v614_v42, %v572_v10  ;;  %v622_v46 = vpop.f32.mrb[6].mxu1  ;;  %v383_v47 = vpop.f32.mrb[7].mxu0 }
  0xf2   : > { %v441_v48 = vmax.f32 %v421_v39, 0.0  ;;  %v431_v49 = vmax.f32 %v381_v40, 0.0  ;;  %v424_v50 = vadd.f32 %v622_v46, %v572_v10  ;;  %v384_v51 = vadd.f32 %v572_v10, %v383_v47  ;;  %v415_v52 = vpop.f32.mrb[7].mxu1 }
  0xf3   : > { %449 = vst [vmem:[%s750_s30 + $0x30] sm:$0xff] %v433_v43  ;;  %v439_v53 = vmax.f32 %v413_v44, 0.0  ;;  %v434_v54 = vmax.f32 %v392_v45, 0.0  ;;  %v416_v55 = vadd.f32 %v572_v10, %v415_v52 }
  0xf4   : > { %457 = vst [vmem:[%s750_s30 + $0x70] sm:$0xff] %v441_v48  ;;  %447 = vst [vmem:[%s750_s30 + $0x20] sm:$0xff] %v431_v49  ;;  %v442_v56 = vmax.f32 %v424_v50, 0.0  ;;  %v432_v57 = vmax.f32 %v384_v51, 0.0 }
  0xf5   : > { %455 = vst [vmem:[%s750_s30 + $0x60] sm:$0xff] %v439_v53  ;;  %450 = vst [vmem:[%s750_s30 + $0x38] sm:$0xff] %v434_v54  ;;  %v440_v58 = vmax.f32 %v416_v55, 0.0 }
  0xf6   : > { %458 = vst [vmem:[%s750_s30 + $0x78] sm:$0xff] %v442_v56  ;;  %448 = vst [vmem:[%s750_s30 + $0x28] sm:$0xff] %v432_v57 }
  0xf7   : > { %456 = vst [vmem:[%s750_s30 + $0x68] sm:$0xff] %v440_v58 }
  0xf8 PF: > { %s13_s14 = sadd.s32 1, %s683_s14   ;;  %s781_s12 = smov %s679_s13 }
  0xf9   : > { %p10_p5 = scmp.ge.s32.totalorder %s13_s14, 17   ;;  %s782_s13 = smov %s784_s15 }
  0xfb   :  { %12 = sbr.rel (!%p10_p5) target bundleno = 2 (0x2), region = 68 }

// kernel: cnn_forward.4
= control target key start
LH: loop header
LB: loop body
LE: loop exit
PB: predicated region body
PF: predicated region fallthrough
CT: control target
= control target key end

     0   :  { %s1178_s12 = smov 0   ;;  %s1180_s13 = smov 0   ;;  %s1354_s0 = inlined_call_operand.vmem [shape: bf16[1664,288], index: 0, kind: input, shape index: {}]   ;;  %s1355_s1 = inlined_call_operand.vmem [shape: bf16[288,128], index: 1, kind: input, shape index: {}]   ;;  %s1356_s2 = inlined_call_operand.vmem [shape: f32[1,128], index: 2, kind: input, shape index: {}]   ;;  %s1357_s3 = inlined_call_operand.vmem [shape: f32[1664,128], index: 3, kind: output, shape index: {}]  }
   0x1   :  { %s1182_s14 = smov 0  }
   0x2 LB: > { %s25_s15 = sadd.s32 1, %s1152_s13  ;;  %p891_p0 = scmp.ge.s32.totalorder %s1156_s14, 1  ;;  %s1156_s14 = sphi %s1182_s14, %s13_s14   ;;  %s1152_s13 = sphi %s1180_s13, %s1359_s13   ;;  %s1148_s12 = sphi %s1178_s12, %s1358_s12  }
   0x3   : > { %p27_p1 = scmp.ge.s32.totalorder %s25_s15, 13  ;;  %p170_p2 = scmp.lt.s32.totalorder %s1156_s14, 14 }
   0x5   : > { %s1361_s15 = smov (%p27_p1, %s25_s15), 0  ;;  %p171_p3 = pnand %p891_p0, %p170_p2 }
   0x6   : > { %v1084_v0 = vld [vmem:[%s1355_s1 + $0x40] sm:$0xff] (!%p171_p3)   ;;  %s892_s18 = sshll.u32 (!%p171_p3), %s1148_s12, 4  ;;  %v1086_v2 = vld [vmem:[%s1355_s1 + $0x48] sm:$0xff] (!%p171_p3)   ;;  %v1088_v4 = vld [vmem:[%s1355_s1 + $0x50] sm:$0xff] (!%p171_p3)   ;;  %vm532_vm0 = vcmask (!%p171_p3), 261120  }
   0x7   : > { %174 = sbr.rel (%p171_p3) target bundleno = 303 (0x12f), region = 32  ;;  %v1085_v1 = vld [vmem:[%s1355_s1] sm:$0xff] (!%p171_p3)   ;;  %949 = vmatprep.subr.bf16.mxu0 (!%p171_p3), %v1084_v0  ;;  %1043 = vmatprep.subr.bf16.mxu1 (!%p171_p3), %v1084_v0  ;;  %p206_p4 = scmp.lt.s32.totalorder (!%p171_p3), %s892_s18, 207  ;;  %v1087_v3 = vld [vmem:[%s1355_s1 + $0x8] sm:$0xff] (!%p171_p3)   ;;  %v1089_v5 = vld [vmem:[%s1355_s1 + $0x10] sm:$0xff] (!%p171_p3)  }
   0x8   : > { %950 = vmatpush3.bf16.msra.mxu0 (!%p171_p3), %v1085_v1  ;;  %1051 = vmatpush3.bf16.msra.mxu1 (!%p171_p3), %v1085_v1  ;;  %v1090_v6 = vld [vmem:[%s1355_s1 + $0x58] sm:$0xff] (!%p171_p3)   ;;  %v1092_v8 = vld [vmem:[%s1355_s1 + $0x60] sm:$0xff] (!%p171_p3)   ;;  %v1094_v10 = vld [vmem:[%s1355_s1 + $0x68] sm:$0xff] (!%p171_p3)  }
   0x9   : > { %951 = vmatprep.subr.bf16.mxu0 (!%p171_p3), %v1086_v2  ;;  %1044 = vmatprep.subr.bf16.mxu1 (!%p171_p3), %v1086_v2  ;;  %v1091_v7 = vld [vmem:[%s1355_s1 + $0x18] sm:$0xff] (!%p171_p3)   ;;  %v1093_v9 = vld [vmem:[%s1355_s1 + $0x20] sm:$0xff] (!%p171_p3)   ;;  %v1095_v13 = vld [vmem:[%s1355_s1 + $0x28] sm:$0xff] (!%p171_p3)  }
   0xa   : > { %v1096_v14 = vld [vmem:[%s1355_s1 + $0x70] sm:$0xff] (!%p171_p3)   ;;  %v1098_v16 = vld [vmem:[%s1355_s1 + $0x78] sm:$0xff] (!%p171_p3)   ;;  %v1106_v19 = vld [vmem:[%s1355_s1 + $0x80] sm:$0xff] (!%p171_p3)  }
   0xb   : > { %v1097_v15 = vld [vmem:[%s1355_s1 + $0x30] sm:$0xff] (!%p171_p3)   ;;  %v1099_v17 = vld [vmem:[%s1355_s1 + $0x38] sm:$0xff] (!%p171_p3)   ;;  %v1113_v23 = vld [vmem:[%s1355_s1 + $0x88] sm:$0xff] (!%p171_p3)  }
   0xc   : > { %952 = vmatpush3.bf16.msra.mxu0 (!%p171_p3), %v1087_v3  ;;  %1052 = vmatpush3.bf16.msra.mxu1 (!%p171_p3), %v1087_v3  ;;  %v1301_v2 = vld [vmem:[%s1356_s2] ss:$0 sm:$0xff] (!%p171_p3) }
   0xd   : > { %953 = vmatprep.subr.bf16.mxu0 (!%p171_p3), %v1088_v4  ;;  %1045 = vmatprep.subr.bf16.mxu1 (!%p171_p3), %v1088_v4 }
   0xe   : > { %s1363_s18 = smov (!%p206_p4, %s892_s18), 207 }
   0xf   : > { %s1059_s4 = smul.u32 12, %s1363_s18  ;;  %s895_s9 = sshll.u32 %s1363_s18, 3 }
  0x10   : > { %954 = vmatpush3.bf16.msra.mxu0 %v1089_v5  ;;  %1053 = vmatpush3.bf16.msra.mxu1 %v1089_v5  ;;  %s1310_s12 = scalar_lea.vmem %s1357_s3, %s895_s9 }
  0x11   : > { %955 = vmatprep.subr.bf16.mxu0 %v1090_v6  ;;  %1046 = vmatprep.subr.bf16.mxu1 %v1090_v6  ;;  %s1229_s11 = scalar_lea.vmem %s1354_s0, %s1059_s4 }
  0x12   : > { %v1102_v11 = vld [vmem:[%s1229_s11 + $0x4] ss:$12 sps:$4 sm:$0xff]   ;;  %v1105_v12 = vld [vmem:[%s1229_s11 + $0x94] ss:$12 sps:$4 sm:$0xff]   ;;  %v1107_v21 = vld [vmem:[%s1229_s11 + $0x1c] ss:$12 sps:$4 sm:$0xff]  }
  0x13   : > { %589 = vmatprep.mubr.bf16.mxu0 %v1102_v11  ;;  %637 = vmatprep.mubr.bf16.mxu1 %v1105_v12  ;;  %v1100_v18 = vld [vmem:[%s1229_s11] ss:$12 sps:$4 sm:$0xff]   ;;  %v1103_v20 = vld [vmem:[%s1229_s11 + $0x90] ss:$12 sps:$4 sm:$0xff]   ;;  %v1111_v24 = vld [vmem:[%s1229_s11 + $0x18] ss:$12 sps:$4 sm:$0xff]  }
  0x14   : > { %956 = vmatpush3.bf16.msra.mxu0 %v1091_v7  ;;  %1054 = vmatpush3.bf16.msra.mxu1 %v1091_v7  ;;  %v1109_v22 = vld [vmem:[%s1229_s11 + $0xac] ss:$12 sps:$4 sm:$0xff]   ;;  %v1112_v25 = vld [vmem:[%s1229_s11 + $0xa8] ss:$12 sps:$4 sm:$0xff]   ;;  %v1117_v28 = vld [vmem:[%s1229_s11 + $0x30] ss:$12 sps:$4 sm:$0xff]  }
  0x15   : > { %957 = vmatprep.subr.bf16.mxu0 %v1092_v8  ;;  %1047 = vmatprep.subr.bf16.mxu1 %v1092_v8  ;;  %v1114_v26 = vld [vmem:[%s1229_s11 + $0x34] ss:$12 sps:$4 sm:$0xff]   ;;  %v1119_v30 = vld [vmem:[%s1229_s11 + $0x4c] ss:$12 sps:$4 sm:$0xff]   ;;  %v1123_v33 = vld [vmem:[%s1229_s11 + $0x50] ss:$12 sps:$4 sm:$0xff]  }
  0x16   : > { %v1116_v27 = vld [vmem:[%s1229_s11 + $0x8] ss:$12 sps:$4 sm:$0xff]   ;;  %v1118_v29 = vld [vmem:[%s1229_s11 + $0x20] ss:$12 sps:$4 sm:$0xff]   ;;  %v1121_v31 = vld [vmem:[%s1229_s11 + $0x38] ss:$12 sps:$4 sm:$0xff]  }
  0x17   : > { %v1122_v32 = vld [vmem:[%s1229_s11 + $0x48] ss:$12 sps:$4 sm:$0xff]   ;;  %v1124_v34 = vld [vmem:[%s1229_s11 + $0x64] ss:$12 sps:$4 sm:$0xff]   ;;  %v1127_v36 = vld [vmem:[%s1229_s11 + $0x60] ss:$12 sps:$4 sm:$0xff]  }
  0x18   : > { %958 = vmatpush3.bf16.msra.mxu0 %v1093_v9  ;;  %1055 = vmatpush3.bf16.msra.mxu1 %v1093_v9  ;;  %v1126_v35 = vld [vmem:[%s1229_s11 + $0x68] ss:$12 sps:$4 sm:$0xff]   ;;  %v1128_v37 = vld [vmem:[%s1229_s11 + $0x80] ss:$12 sps:$4 sm:$0xff]   ;;  %v1131_v39 = vld [vmem:[%s1229_s11 + $0x98] ss:$12 sps:$4 sm:$0xff]  }
  0x19   : > { %959 = vmatprep.subr.bf16.mxu0 %v1094_v10  ;;  %1048 = vmatprep.subr.bf16.mxu1 %v1094_v10  ;;  %v1129_v38 = vld [vmem:[%s1229_s11 + $0x7c] ss:$12 sps:$4 sm:$0xff]   ;;  %v1132_v40 = vld [vmem:[%s1229_s11 + $0x78] ss:$12 sps:$4 sm:$0xff]  }
  0x1a   : > { %v1133_v41 = vld [vmem:[%s1229_s11 + $0xb0] ss:$12 sps:$4 sm:$0xff]  }
  0x1c   : > { %960 = vmatpush3.bf16.msra.mxu0 %v1095_v13  ;;  %1056 = vmatpush3.bf16.msra.mxu1 %v1095_v13 }
  0x1d   : > { %961 = vmatprep.subr.bf16.mxu0 %v1096_v14  ;;  %1049 = vmatprep.subr.bf16.mxu1 %v1096_v14 }
  0x20   : > { %962 = vmatpush3.bf16.msra.mxu0 %v1097_v15  ;;  %1057 = vmatpush3.bf16.msra.mxu1 %v1097_v15 }
  0x21   : > { %963 = vmatprep.subr.bf16.mxu0 %v1098_v16  ;;  %1050 = vmatprep.subr.bf16.mxu1 %v1098_v16 }
  0x24   : > { %964 = vmatpush3.bf16.msra.mxu0 %v1099_v17  ;;  %1058 = vmatpush3.bf16.msra.mxu1 %v1099_v17 }
  0x25   : > { %1023 = vmatprep.subr.bf16.mxu1 %v1106_v19 }
  0x27   : > { %590 = vmatmul.mubr.bf16.vlgmr.msra.gmra.mrb[0].mxu0 %v1100_v18  ;;  %638 = vmatmul.mubr.bf16.vlgmr.msra.gmra.mrb[0].mxu1 %v1103_v20 }
  0x28   : > { %1024 = vmatpush3.bf16.msra.mxu1 %v1106_v19  ;;  %597 = vmatprep.mubr.bf16.mxu0 %v1107_v21 }
  0x29   : > { %645 = vmatprep.mubr.bf16.mxu1 %v1109_v22  ;;  %1025 = vmatprep.subr.bf16.mxu1 %v1113_v23 }
  0x2c   : > { %1026 = vmatpush3.bf16.msra.mxu1 %v1113_v23 }
  0x2f   : > { %598 = vmatmul.mubr.bf16.gmra.mrb[4].mxu0 %v1111_v24  ;;  %646 = vmatmul.mubr.bf16.gmra.mrb[4].mxu1 %v1112_v25 }
  0x30   : > { %605 = vmatprep.mubr.bf16.mxu0 %v1114_v26  ;;  %1027 = vmatprep.mubr.msk.bf16.mxu1 %vm532_vm0, %v1116_v27 }
  0x37   : > { %606 = vmatmul.mubr.bf16.gmra.mrb[8].mxu0 %v1117_v28  ;;  %1028 = vmatmul.mubr.msk.bf16.vlgmr.msra.gmra.mrb[8].mxu1 %vm532_vm0, %v1118_v29 }
  0x38   : > { %613 = vmatprep.mubr.bf16.mxu0 %v1119_v30  ;;  %1031 = vmatprep.mubr.msk.bf16.mxu1 %vm532_vm0, %v1121_v31 }
  0x3f   : > { %614 = vmatmul.mubr.bf16.gmra.mrb[12].mxu0 %v1122_v32  ;;  %1032 = vmatmul.mubr.msk.bf16.gmra.mrb[12].mxu1 %vm532_vm0, %v1123_v33 }
  0x40   : > { %621 = vmatprep.mubr.bf16.mxu0 %v1124_v34  ;;  %1035 = vmatprep.mubr.msk.bf16.mxu1 %vm532_vm0, %v1126_v35 }
  0x47   : > { %622 = vmatmul.mubr.bf16.gmra.mrb[16].mxu0 %v1127_v36  ;;  %1036 = vmatmul.mubr.msk.bf16.gmra.mrb[16].mxu1 %vm532_vm0, %v1128_v37 }
  0x48   : > { %629 = vmatprep.mubr.bf16.mxu0 %v1129_v38  ;;  %1039 = vmatprep.mubr.msk.bf16.mxu1 %vm532_vm0, %v1131_v39 }
  0x4f   : > { %630 = vmatmul.mubr.bf16.gmra.mrb[20].mxu0 %v1132_v40  ;;  %1040 = vmatmul.mubr.msk.bf16.gmra.mrb[20].mxu1 %vm532_vm0, %v1133_v41 }
  0xfa   : > { %v965_v42 = vpop.f32.mrb[0].mxu0  ;;  %v1001_v43 = vpop.f32.mrb[0].mxu1 }
  0xfb   : > { %v966_v44 = vpop.f32.mrb[1].mxu0  ;;  %v1002_v45 = vpop.f32.mrb[1].mxu1 }
  0xfc   : > { %v967_v46 = vadd.f32 %v966_v44, %v965_v42  ;;  %v968_v47 = vpop.f32.mrb[2].mxu0  ;;  %v1290_v48 = vadd.f32 %v1002_v45, %v1001_v43  ;;  %v1004_v49 = vpop.f32.mrb[2].mxu1 }
  0xfd   : > { %v969_v50 = vpop.f32.mrb[3].mxu0  ;;  %v1005_v51 = vpop.f32.mrb[3].mxu1 }
  0xfe   : > { %v970_v52 = vadd.f32 %v969_v50, %v968_v47  ;;  %v1292_v53 = vadd.f32 %v1005_v51, %v1004_v49  ;;  %v592_v6 = vadd.f32 %v967_v46, %v1301_v2 }
 0x100   : > { %v595_v15 = vadd.f32 %v970_v52, %v1301_v2 }
 0x102   : > { %v971_v54 = vpop.f32.mrb[4].mxu0  ;;  %v1007_v55 = vpop.f32.mrb[4].mxu1 }
 0x103   : > { %v972_v56 = vpop.f32.mrb[5].mxu0  ;;  %v1008_v57 = vpop.f32.mrb[5].mxu1 }
 0x104   : > { %v973_v58 = vadd.f32 %v972_v56, %v971_v54  ;;  %v974_v59 = vpop.f32.mrb[6].mxu0  ;;  %v1294_v60 = vadd.f32 %v1008_v57, %v1007_v55  ;;  %v1010_v61 = vpop.f32.mrb[6].mxu1 }
 0x105   : > { %v975_v62 = vpop.f32.mrb[7].mxu0  ;;  %v1011_v63 = vpop.f32.mrb[7].mxu1 }
 0x106   : > { %v976_v0 = vadd.f32 %v975_v62, %v974_v59  ;;  %v1296_v1 = vadd.f32 %v1011_v63, %v1010_v61  ;;  %v600_v3 = vadd.f32 %v973_v58, %v1301_v2  ;;  %v648_v63 = vadd.f32 %v1294_v60, %v1301_v2 }
 0x108   : > { %v603_v10 = vadd.f32 %v976_v0, %v1301_v2 }
 0x10a   : > { %v977_v4 = vpop.f32.mrb[8].mxu0  ;;  %v1029_v5 = vpop.f32.mrb[8].mxu1 }
 0x10b   : > { %v697_v7 = vadd.f32 %v1029_v5, %v600_v3  ;;  %v978_v8 = vpop.f32.mrb[9].mxu0  ;;  %v688_v9 = vpop.f32.mrb[9].mxu1 }
 0x10c   : > { %v979_v11 = vadd.f32 %v978_v8, %v977_v4  ;;  %v689_v12 = vadd.f32 %v688_v9, %v592_v6  ;;  %v980_v13 = vpop.f32.mrb[10].mxu0  ;;  %v1030_v14 = vpop.f32.mrb[10].mxu1  ;;  %v640_v6 = vadd.f32 %v1290_v48, %v1301_v2 }
 0x10d   : > { %v753_v16 = vmax.f32 %v697_v7, 0.0  ;;  %v700_v17 = vadd.f32 %v1030_v14, %v603_v10  ;;  %v981_v18 = vpop.f32.mrb[11].mxu0  ;;  %v691_v19 = vpop.f32.mrb[11].mxu1  ;;  %v651_v10 = vadd.f32 %v1296_v1, %v1301_v2 }
 0x10e   : > { %v751_v20 = vmax.f32 %v689_v12, 0.0  ;;  %v982_v21 = vadd.f32 %v981_v18, %v980_v13  ;;  %v692_v22 = vadd.f32 %v691_v19, %v595_v15  ;;  %v608_v27 = vadd.f32 %v979_v11, %v1301_v2 }
 0x10f   : > { %769 = vst [vmem:[%s1310_s12 + $0x10] sm:$0xff] %v753_v16  ;;  %v754_v23 = vmax.f32 %v700_v17, 0.0  ;;  %v643_v15 = vadd.f32 %v1292_v53, %v1301_v2 }
 0x110   : > { %767 = vst [vmem:[%s1310_s12] sm:$0xff] %v751_v20  ;;  %v752_v24 = vmax.f32 %v692_v22, 0.0  ;;  %v611_v34 = vadd.f32 %v982_v21, %v1301_v2 }
 0x111   : > { %770 = vst [vmem:[%s1310_s12 + $0x18] sm:$0xff] %v754_v23 }
 0x112   : > { %768 = vst [vmem:[%s1310_s12 + $0x8] sm:$0xff] %v752_v24  ;;  %v983_v25 = vpop.f32.mrb[12].mxu0  ;;  %v1033_v26 = vpop.f32.mrb[12].mxu1 }
 0x113   : > { %v984_v28 = vpop.f32.mrb[13].mxu0  ;;  %v704_v29 = vpop.f32.mrb[13].mxu1 }
 0x114   : > { %v985_v30 = vadd.f32 %v984_v28, %v983_v25  ;;  %v705_v31 = vadd.f32 %v704_v29, %v608_v27  ;;  %v986_v32 = vpop.f32.mrb[14].mxu0  ;;  %v1034_v33 = vpop.f32.mrb[14].mxu1 }
 0x115   : > { %v987_v35 = vpop.f32.mrb[15].mxu0  ;;  %v707_v36 = vpop.f32.mrb[15].mxu1 }
 0x116   : > { %v616_v37 = vadd.f32 %v985_v30, %v1301_v2  ;;  %v755_v38 = vmax.f32 %v705_v31, 0.0  ;;  %v988_v39 = vadd.f32 %v987_v35, %v986_v32  ;;  %v708_v40 = vadd.f32 %v707_v36, %v611_v34 }
 0x118   : > { %v713_v41 = vadd.f32 %v1033_v26, %v616_v37  ;;  %771 = vst [vmem:[%s1310_s12 + $0x20] sm:$0xff] %v755_v38  ;;  %v619_v42 = vadd.f32 %v988_v39, %v1301_v2  ;;  %v756_v43 = vmax.f32 %v708_v40, 0.0 }
 0x11a   : > { %v757_v44 = vmax.f32 %v713_v41, 0.0  ;;  %v716_v45 = vadd.f32 %v1034_v33, %v619_v42  ;;  %772 = vst [vmem:[%s1310_s12 + $0x28] sm:$0xff] %v756_v43  ;;  %v989_v46 = vpop.f32.mrb[16].mxu0  ;;  %v1037_v47 = vpop.f32.mrb[16].mxu1 }
 0x11b   : > { %v990_v49 = vpop.f32.mrb[17].mxu0  ;;  %v720_v50 = vpop.f32.mrb[17].mxu1 }
 0x11c   : > { %773 = vst [vmem:[%s1310_s12 + $0x30] sm:$0xff] %v757_v44  ;;  %v758_v51 = vmax.f32 %v716_v45, 0.0  ;;  %v991_v52 = vadd.f32 %v990_v49, %v989_v46  ;;  %v992_v54 = vpop.f32.mrb[18].mxu0  ;;  %v1038_v55 = vpop.f32.mrb[18].mxu1 }
 0x11d   : > { %v993_v56 = vpop.f32.mrb[19].mxu0  ;;  %v723_v57 = vpop.f32.mrb[19].mxu1 }
 0x11e   : > { %774 = vst [vmem:[%s1310_s12 + $0x38] sm:$0xff] %v758_v51  ;;  %v624_v58 = vadd.f32 %v991_v52, %v1301_v2  ;;  %v994_v59 = vadd.f32 %v993_v56, %v992_v54 }
 0x120   : > { %v721_v61 = vadd.f32 %v720_v50, %v624_v58  ;;  %v627_v62 = vadd.f32 %v994_v59, %v1301_v2 }
 0x122   : > { %v759_v0 = vmax.f32 %v721_v61, 0.0  ;;  %v724_v3 = vadd.f32 %v723_v57, %v627_v62  ;;  %v995_v4 = vpop.f32.mrb[20].mxu0  ;;  %v1041_v5 = vpop.f32.mrb[20].mxu1 }
 0x123   : > { %v745_v7 = vadd.f32 %v1041_v5, %v648_v63  ;;  %v996_v8 = vpop.f32.mrb[21].mxu0  ;;  %v736_v9 = vpop.f32.mrb[21].mxu1 }
 0x124   : > { %775 = vst [vmem:[%s1310_s12 + $0x40] sm:$0xff] %v759_v0  ;;  %v760_v11 = vmax.f32 %v724_v3, 0.0  ;;  %v997_v12 = vadd.f32 %v996_v8, %v995_v4  ;;  %v737_v13 = vadd.f32 %v736_v9, %v640_v6  ;;  %v998_v60 = vpop.f32.mrb[22].mxu0  ;;  %v1042_v14 = vpop.f32.mrb[22].mxu1 }
 0x125   : > { %v765_v48 = vmax.f32 %v745_v7, 0.0  ;;  %v748_v16 = vadd.f32 %v1042_v14, %v651_v10  ;;  %v999_v17 = vpop.f32.mrb[23].mxu0  ;;  %v739_v18 = vpop.f32.mrb[23].mxu1 }
 0x126   : > { %776 = vst [vmem:[%s1310_s12 + $0x48] sm:$0xff] %v760_v11  ;;  %v632_v1 = vadd.f32 %v997_v12, %v1301_v2  ;;  %v763_v19 = vmax.f32 %v737_v13, 0.0  ;;  %v1000_v20 = vadd.f32 %v999_v17, %v998_v60  ;;  %v740_v21 = vadd.f32 %v739_v18, %v643_v15 }
 0x127   : > { %781 = vst [vmem:[%s1310_s12 + $0x70] sm:$0xff] %v765_v48  ;;  %v766_v22 = vmax.f32 %v748_v16, 0.0 }
 0x128   : > { %v729_v23 = vadd.f32 %v1037_v47, %v632_v1  ;;  %779 = vst [vmem:[%s1310_s12 + $0x60] sm:$0xff] %v763_v19  ;;  %v635_v53 = vadd.f32 %v1000_v20, %v1301_v2  ;;  %v764_v24 = vmax.f32 %v740_v21, 0.0 }
 0x129   : > { %782 = vst [vmem:[%s1310_s12 + $0x78] sm:$0xff] %v766_v22 }
 0x12a   : > { %v761_v25 = vmax.f32 %v729_v23, 0.0  ;;  %v732_v26 = vadd.f32 %v1038_v55, %v635_v53  ;;  %780 = vst [vmem:[%s1310_s12 + $0x68] sm:$0xff] %v764_v24 }
 0x12c   : > { %777 = vst [vmem:[%s1310_s12 + $0x50] sm:$0xff] %v761_v25  ;;  %v762_v27 = vmax.f32 %v732_v26, 0.0 }
 0x12e   : > { %778 = vst [vmem:[%s1310_s12 + $0x58] sm:$0xff] %v762_v27 }
 0x12f PF: > { %s13_s14 = sadd.s32 1, %s1156_s14   ;;  %s1358_s12 = smov %s1152_s13 }
 0x130   : > { %p10_p5 = scmp.ge.s32.totalorder %s13_s14, 15   ;;  %s1359_s13 = smov %s1361_s15 }
 0x132   :  { %12 = sbr.rel (!%p10_p5) target bundleno = 2 (0x2), region = 68 }

// kernel: cnn_forward.5
= control target key start
LH: loop header
LB: loop body
LE: loop exit
PB: predicated region body
PF: predicated region fallthrough
CT: control target
= control target key end

     0   :  { %s4002_s18 = smov 0   ;;  %s4004_s19 = smov 0   ;;  %s4409_s0 = inlined_call_operand.vmem [shape: bf16[16,50176], index: 0, kind: input, shape index: {}]   ;;  %s4410_s1 = inlined_call_operand.vmem [shape: bf16[50176,128], index: 1, kind: input, shape index: {}]   ;;  %s4411_s2 = inlined_call_operand.vmem [shape: f32[1,128], index: 2, kind: input, shape index: {}]   ;;  %s4412_s3 = inlined_call_operand.vmem [shape: bf16[128,128], index: 3, kind: input, shape index: {}]   ;;  %s4413_s4 = inlined_call_operand.vmem [shape: f32[1,128], index: 4, kind: input, shape index: {}]   ;;  %s4414_s5 = inlined_call_operand.vmem [shape: f32[16,128], index: 5, kind: output, shape index: {}]  }
   0x1   :  { %s4006_s20 = smov 0  }
   0x2 LB: > { %s4018_s21 = sadd.s32 4294967295, %s3967_s20   ;;  %s4021_s22 = sadd.s32 1, %s3967_s20   ;;  %s3967_s20 = sphi %s4006_s20, %s4417_s20   ;;  %s3963_s19 = sphi %s4004_s19, %s4416_s19   ;;  %s3959_s18 = sphi %s4002_s18, %s4415_s18  }
   0x3   : > { %s19_s23 = ssub.s32 %s3967_s20, %s4021_s22  ;;  %s22_s24 = sadd.s32 1, %s3963_s19 }
   0x4   : > { %p20_p0 = scmp.eq.s32.totalorder %s19_s23, 0  ;;  %p29_p1 = scmp.ne.s32.totalorder %s3963_s19, %s3959_s18 }
   0x5   : > { %p30_p2 = scmp.eq.s32.totalorder %s3967_s20, 0  ;;  %p3034_p4 = scmp.ge.s32.totalorder %s3967_s20, 14 }
   0x6   : > { %s4030_s25 = scalar_select %p20_p0, %s3963_s19, %s22_s24  }
   0x7   : > { %p31_p3 = por %p30_p2, %p29_p1  ;;  %174 = sbr.rel (%p3034_p4) target bundleno = 33 (0x21), region = 28 }
   0xe   : > { %177 = sbr.rel (!%p31_p3) target bundleno = 33 (0x21), region = 32  ;;  %s179_s26 = sand.u32 (%p31_p3), 1, %s3963_s19  }
   0xf   : > { %s3304_s27 = smul.u32 (%p31_p3), 112, %s3967_s20 }
  0x10   : > { %s3642_s28 = smul.u32 (%p31_p3), 224, %s179_s26 }
  0x11   : > { %s4038_s6 = scalar_lea.vmem (%p31_p3), %s4409_s0, %s3304_s27 }
  0x12   : > { %v197_v0 = vld [vmem:[%s4038_s6] sm:$0xff] (%p31_p3)  ;;  %v199_v1 = vld [vmem:[%s4038_s6 + $0x8] sm:$0xff] (%p31_p3)  ;;  %v201_v2 = vld [vmem:[%s4038_s6 + $0x10] sm:$0xff] (%p31_p3)  ;;  %s4043_s7 = scalar_lea.vmem (%p31_p3), [#allocation3], %s3642_s28 }
  0x13   : > { %198 = vst [vmem:[%s4043_s7] sm:$0xff] (%p31_p3), %v197_v0  ;;  %200 = vst [vmem:[%s4043_s7 + $0x8] sm:$0xff] (%p31_p3), %v199_v1  ;;  %v203_v3 = vld [vmem:[%s4038_s6 + $0x18] sm:$0xff] (%p31_p3)  ;;  %v205_v4 = vld [vmem:[%s4038_s6 + $0x20] sm:$0xff] (%p31_p3) }
  0x14   : > { %202 = vst [vmem:[%s4043_s7 + $0x10] sm:$0xff] (%p31_p3), %v201_v2  ;;  %v207_v5 = vld [vmem:[%s4038_s6 + $0x28] sm:$0xff] (%p31_p3)  ;;  %204 = vst [vmem:[%s4043_s7 + $0x18] sm:$0xff] (%p31_p3), %v203_v3  ;;  %v209_v6 = vld [vmem:[%s4038_s6 + $0x30] sm:$0xff] (%p31_p3) }
  0x15   : > { %206 = vst [vmem:[%s4043_s7 + $0x20] sm:$0xff] %v205_v4  ;;  %208 = vst [vmem:[%s4043_s7 + $0x28] sm:$0xff] %v207_v5  ;;  %v211_v7 = vld [vmem:[%s4038_s6 + $0x38] sm:$0xff]  ;;  %v213_v8 = vld [vmem:[%s4038_s6 + $0x40] sm:$0xff] }
  0x16   : > { %210 = vst [vmem:[%s4043_s7 + $0x30] sm:$0xff] %v209_v6  ;;  %212 = vst [vmem:[%s4043_s7 + $0x38] sm:$0xff] %v211_v7  ;;  %v215_v9 = vld [vmem:[%s4038_s6 + $0x48] sm:$0xff]  ;;  %v217_v10 = vld [vmem:[%s4038_s6 + $0x50] sm:$0xff] }
  0x17   : > { %214 = vst [vmem:[%s4043_s7 + $0x40] sm:$0xff] %v213_v8  ;;  %v219_v11 = vld [vmem:[%s4038_s6 + $0x58] sm:$0xff]  ;;  %216 = vst [vmem:[%s4043_s7 + $0x48] sm:$0xff] %v215_v9  ;;  %v221_v12 = vld [vmem:[%s4038_s6 + $0x60] sm:$0xff] }
  0x18   : > { %218 = vst [vmem:[%s4043_s7 + $0x50] sm:$0xff] %v217_v10  ;;  %220 = vst [vmem:[%s4043_s7 + $0x58] sm:$0xff] %v219_v11  ;;  %v223_v13 = vld [vmem:[%s4038_s6 + $0x68] sm:$0xff]  ;;  %v225_v14 = vld [vmem:[%s4038_s6 + $0x620] sm:$0xff] }
  0x19   : > { %222 = vst [vmem:[%s4043_s7 + $0x60] sm:$0xff] %v221_v12  ;;  %224 = vst [vmem:[%s4043_s7 + $0x68] sm:$0xff] %v223_v13  ;;  %v227_v15 = vld [vmem:[%s4038_s6 + $0x628] sm:$0xff]  ;;  %v229_v16 = vld [vmem:[%s4038_s6 + $0x630] sm:$0xff] }
  0x1a   : > { %226 = vst [vmem:[%s4043_s7 + $0x70] sm:$0xff] %v225_v14  ;;  %v231_v17 = vld [vmem:[%s4038_s6 + $0x638] sm:$0xff]  ;;  %228 = vst [vmem:[%s4043_s7 + $0x78] sm:$0xff] %v227_v15  ;;  %v233_v18 = vld [vmem:[%s4038_s6 + $0x640] sm:$0xff] }
  0x1b   : > { %230 = vst [vmem:[%s4043_s7 + $0x80] sm:$0xff] %v229_v16  ;;  %232 = vst [vmem:[%s4043_s7 + $0x88] sm:$0xff] %v231_v17  ;;  %v235_v19 = vld [vmem:[%s4038_s6 + $0x648] sm:$0xff]  ;;  %v237_v20 = vld [vmem:[%s4038_s6 + $0x650] sm:$0xff] }
  0x1c   : > { %234 = vst [vmem:[%s4043_s7 + $0x90] sm:$0xff] %v233_v18  ;;  %236 = vst [vmem:[%s4043_s7 + $0x98] sm:$0xff] %v235_v19  ;;  %v239_v21 = vld [vmem:[%s4038_s6 + $0x658] sm:$0xff]  ;;  %v241_v22 = vld [vmem:[%s4038_s6 + $0x660] sm:$0xff] }
  0x1d   : > { %238 = vst [vmem:[%s4043_s7 + $0xa0] sm:$0xff] %v237_v20  ;;  %v243_v23 = vld [vmem:[%s4038_s6 + $0x668] sm:$0xff]  ;;  %240 = vst [vmem:[%s4043_s7 + $0xa8] sm:$0xff] %v239_v21  ;;  %v245_v24 = vld [vmem:[%s4038_s6 + $0x670] sm:$0xff] }
  0x1e   : > { %242 = vst [vmem:[%s4043_s7 + $0xb0] sm:$0xff] %v241_v22  ;;  %244 = vst [vmem:[%s4043_s7 + $0xb8] sm:$0xff] %v243_v23  ;;  %v247_v25 = vld [vmem:[%s4038_s6 + $0x678] sm:$0xff]  ;;  %v249_v26 = vld [vmem:[%s4038_s6 + $0x680] sm:$0xff] }
  0x1f   : > { %246 = vst [vmem:[%s4043_s7 + $0xc0] sm:$0xff] %v245_v24  ;;  %248 = vst [vmem:[%s4043_s7 + $0xc8] sm:$0xff] %v247_v25  ;;  %v251_v27 = vld [vmem:[%s4038_s6 + $0x688] sm:$0xff] }
  0x20   : > { %250 = vst [vmem:[%s4043_s7 + $0xd0] sm:$0xff] %v249_v26  ;;  %252 = vst [vmem:[%s4043_s7 + $0xd8] sm:$0xff] %v251_v27 }
  0x21 PF: > { %p3036_p5 = scmp.ge.s32.totalorder %s3967_s20, 1  ;;  %p266_p6 = scmp.lt.s32.totalorder %s3967_s20, 15 }
  0x23   : > { %p267_p7 = pnand %p3036_p5, %p266_p6 }
  0x24   : > { %s273_s8 = sand.u32 (!%p267_p7), 1, %s3959_s18   ;;  %s301_s9 = smul.u32 (!%p267_p7), 448, %s4018_s21 }
  0x25   : > { %270 = sbr.rel (%p267_p7) target bundleno = 731 (0x2db), region = 59  ;;  %p3038_p9 = scmp.ne.s32.totalorder (!%p267_p7), %s4018_s21, 0 }
  0x26   : > { %s3643_s10 = smul.u32 (!%p267_p7), 224, %s273_s8  ;;  %p302_p8 = scmp.lt.s32.totalorder (!%p267_p7), %s301_s9, 6271 }
  0x28   : > { %s4107_s15 = scalar_lea.vmem (!%p267_p7), [#allocation3], %s3643_s10 }
  0x2c   : > { %s4419_s9 = smov (!%p302_p8, %s301_s9), 6271  ;;  %311 = sbr.rel (%p3038_p9) target bundleno = 51 (0x33), region = 67 }
  0x2d   : > { %s3037_s11 = sshll.u32 %s4419_s9, 2  ;;  %v3969_v28 = vmov (!%p3038_p9), 0.0  }
  0x2e   : > { %s4105_s14 = scalar_lea.vmem %s4410_s1, %s3037_s11  ;;  %312 = vst [vmem:[#allocation2] sm:$0xff] (!%p3038_p9), %v3969_v28  ;;  %313 = vst [vmem:[#allocation2 + $0x8] sm:$0xff] (!%p3038_p9), %v3969_v28 }
  0x33 PF: > { %v3671_v29 = vld [vmem:[%s4105_s14 + $0x40] sm:$0xff]   ;;  %v3675_v33 = vld [vmem:[%s4105_s14 + $0x48] sm:$0xff]   ;;  %v3679_v37 = vld [vmem:[%s4105_s14 + $0x50] sm:$0xff]   ;;  %p3291_p10 = scmp.ne.s32.totalorder %s4018_s21, 13 }
  0x34   : > { %v3672_v30 = vld [vmem:[%s4105_s14 + $0xc0] sm:$0xff]   ;;  %3305 = vmatprep.subr.bf16.mxu0 %v3671_v29  ;;  %v3676_v34 = vld [vmem:[%s4105_s14 + $0xc8] sm:$0xff]   ;;  %v3680_v38 = vld [vmem:[%s4105_s14 + $0xd0] sm:$0xff]   ;;  %vm3971_vm0 = vmmov (!%p3291_p10), 0  }
  0x35   : > { %v3673_v31 = vld [vmem:[%s4105_s14] sm:$0xff]   ;;  %3327 = vmatprep.subr.bf16.mxu1 %v3672_v30  ;;  %v3677_v35 = vld [vmem:[%s4105_s14 + $0x8] sm:$0xff]   ;;  %v3681_v39 = vld [vmem:[%s4105_s14 + $0x10] sm:$0xff]  }
  0x36   : > { %v3674_v32 = vld [vmem:[%s4105_s14 + $0x80] sm:$0xff]   ;;  %3306 = vmatpush3.bf16.msra.mxu0 %v3673_v31  ;;  %v3678_v36 = vld [vmem:[%s4105_s14 + $0x88] sm:$0xff]   ;;  %v3682_v40 = vld [vmem:[%s4105_s14 + $0x90] sm:$0xff]  }
  0x37   : > { %3328 = vmatpush3.bf16.msra.mxu1 %v3674_v32  ;;  %3307 = vmatprep.subr.bf16.mxu0 %v3675_v33  ;;  %v3683_v41 = vld [vmem:[%s4105_s14 + $0x58] sm:$0xff]   ;;  %v3687_v45 = vld [vmem:[%s4105_s14 + $0x60] sm:$0xff]   ;;  %v3691_v49 = vld [vmem:[%s4105_s14 + $0x68] sm:$0xff]  }
  0x38   : > { %3329 = vmatprep.subr.bf16.mxu1 %v3676_v34  ;;  %v3684_v42 = vld [vmem:[%s4105_s14 + $0xd8] sm:$0xff]   ;;  %v3688_v46 = vld [vmem:[%s4105_s14 + $0xe0] sm:$0xff]   ;;  %v3692_v50 = vld [vmem:[%s4105_s14 + $0xe8] sm:$0xff]  }
  0x39   : > { %v3685_v43 = vld [vmem:[%s4105_s14 + $0x18] sm:$0xff]   ;;  %v3689_v47 = vld [vmem:[%s4105_s14 + $0x20] sm:$0xff]   ;;  %v3693_v51 = vld [vmem:[%s4105_s14 + $0x28] sm:$0xff]  }
  0x3a   : > { %3308 = vmatpush3.bf16.msra.mxu0 %v3677_v35  ;;  %v3686_v44 = vld [vmem:[%s4105_s14 + $0x98] sm:$0xff]   ;;  %v3690_v48 = vld [vmem:[%s4105_s14 + $0xa0] sm:$0xff]   ;;  %v3694_v52 = vld [vmem:[%s4105_s14 + $0xa8] sm:$0xff]  }
  0x3b   : > { %3330 = vmatpush3.bf16.msra.mxu1 %v3678_v36  ;;  %3309 = vmatprep.subr.bf16.mxu0 %v3679_v37  ;;  %v3695_v53 = vld [vmem:[%s4105_s14 + $0x70] sm:$0xff]   ;;  %v3699_v57 = vld [vmem:[%s4105_s14 + $0x78] sm:$0xff]   ;;  %v3709_v1 = vld [vmem:[%s4105_s14 + $0x140] sm:$0xff]  }
  0x3c   : > { %3331 = vmatprep.subr.bf16.mxu1 %v3680_v38  ;;  %v3696_v54 = vld [vmem:[%s4105_s14 + $0xf0] sm:$0xff]   ;;  %v3700_v58 = vld [vmem:[%s4105_s14 + $0xf8] sm:$0xff]   ;;  %v3710_v2 = vld [vmem:[%s4105_s14 + $0x1c0] sm:$0xff]  }
  0x3d   : > { %v3697_v55 = vld [vmem:[%s4105_s14 + $0x30] sm:$0xff]   ;;  %v3701_v59 = vld [vmem:[%s4105_s14 + $0x38] sm:$0xff]   ;;  %v3711_v3 = vld [vmem:[%s4105_s14 + $0x100] sm:$0xff]  }
  0x3e   : > { %3310 = vmatpush3.bf16.msra.mxu0 %v3681_v39  ;;  %v3698_v56 = vld [vmem:[%s4105_s14 + $0xb0] sm:$0xff]   ;;  %v3702_v60 = vld [vmem:[%s4105_s14 + $0xb8] sm:$0xff]   ;;  %v3712_v4 = vld [vmem:[%s4105_s14 + $0x180] sm:$0xff]  }
  0x3f   : > { %3332 = vmatpush3.bf16.msra.mxu1 %v3682_v40  ;;  %3311 = vmatprep.subr.bf16.mxu0 %v3683_v41  ;;  %v3703_v61 = vld [vmem:[%s4107_s15] ss:$112 sps:$4 sm:$0xff]   ;;  %v3705_v62 = vld [vmem:[%s4107_s15 + $0x4] ss:$112 sps:$4 sm:$0xff]   ;;  %v3706_v63 = vld [vmem:[%s4107_s15 + $0x8] ss:$112 sps:$4 sm:$0xff]  }
  0x40   : > { %3333 = vmatprep.subr.bf16.mxu1 %v3684_v42  ;;  %v3708_v0 = vld [vmem:[%s4107_s15 + $0xc] ss:$112 sps:$4 sm:$0xff]   ;;  %2308 = vmatprep.mubr.bf16.mxu0 %v3705_v62  ;;  %v3717_v9 = vld [vmem:[%s4105_s14 + $0x150] sm:$0xff]   ;;  %v3725_v17 = vld [vmem:[%s4105_s14 + $0x160] sm:$0xff]  }
  0x41   : > { %2349 = vmatprep.mubr.bf16.mxu1 %v3708_v0  ;;  %v3713_v5 = vld [vmem:[%s4105_s14 + $0x148] sm:$0xff]   ;;  %v3718_v10 = vld [vmem:[%s4105_s14 + $0x1d0] sm:$0xff]   ;;  %v3721_v13 = vld [vmem:[%s4105_s14 + $0x158] sm:$0xff]  }
  0x42   : > { %3312 = vmatpush3.bf16.msra.mxu0 %v3685_v43  ;;  %v3714_v6 = vld [vmem:[%s4105_s14 + $0x1c8] sm:$0xff]   ;;  %v3719_v11 = vld [vmem:[%s4105_s14 + $0x110] sm:$0xff]   ;;  %v3722_v14 = vld [vmem:[%s4105_s14 + $0x1d8] sm:$0xff]  }
  0x43   : > { %3334 = vmatpush3.bf16.msra.mxu1 %v3686_v44  ;;  %3313 = vmatprep.subr.bf16.mxu0 %v3687_v45  ;;  %v3715_v7 = vld [vmem:[%s4105_s14 + $0x108] sm:$0xff]   ;;  %v3720_v12 = vld [vmem:[%s4105_s14 + $0x190] sm:$0xff]   ;;  %v3723_v15 = vld [vmem:[%s4105_s14 + $0x118] sm:$0xff]  }
  0x44   : > { %3335 = vmatprep.subr.bf16.mxu1 %v3688_v46  ;;  %v3716_v8 = vld [vmem:[%s4105_s14 + $0x188] sm:$0xff]   ;;  %v3724_v16 = vld [vmem:[%s4105_s14 + $0x198] sm:$0xff]   ;;  %v3726_v18 = vld [vmem:[%s4105_s14 + $0x1e0] sm:$0xff]  }
  0x45   : > { %v3727_v19 = vld [vmem:[%s4105_s14 + $0x120] sm:$0xff]   ;;  %v3729_v21 = vld [vmem:[%s4105_s14 + $0x168] sm:$0xff]   ;;  %v3733_v25 = vld [vmem:[%s4105_s14 + $0x170] sm:$0xff]  }
  0x46   : > { %3314 = vmatpush3.bf16.msra.mxu0 %v3689_v47  ;;  %v3728_v20 = vld [vmem:[%s4105_s14 + $0x1a0] sm:$0xff]   ;;  %v3730_v22 = vld [vmem:[%s4105_s14 + $0x1e8] sm:$0xff]   ;;  %v3734_v26 = vld [vmem:[%s4105_s14 + $0x1f0] sm:$0xff]  }
  0x47   : > { %3336 = vmatpush3.bf16.msra.mxu1 %v3690_v48  ;;  %3315 = vmatprep.subr.bf16.mxu0 %v3691_v49  ;;  %v3731_v23 = vld [vmem:[%s4105_s14 + $0x128] sm:$0xff]   ;;  %v3735_v27 = vld [vmem:[%s4105_s14 + $0x130] sm:$0xff]   ;;  %v3737_v29 = vld [vmem:[%s4105_s14 + $0x178] sm:$0xff]  }
  0x48   : > { %3337 = vmatprep.subr.bf16.mxu1 %v3692_v50  ;;  %v3732_v24 = vld [vmem:[%s4105_s14 + $0x1a8] sm:$0xff]   ;;  %v3736_v28 = vld [vmem:[%s4105_s14 + $0x1b0] sm:$0xff]   ;;  %v3738_v30 = vld [vmem:[%s4105_s14 + $0x1f8] sm:$0xff]  }
  0x49   : > { %v3739_v31 = vld [vmem:[%s4105_s14 + $0x138] sm:$0xff]   ;;  %v3741_v33 = vld [vmem:[%s4107_s15 + $0x10] ss:$112 sps:$4 sm:$0xff]   ;;  %v3743_v34 = vld [vmem:[%s4107_s15 + $0x14] ss:$112 sps:$4 sm:$0xff]  }
  0x4a   : > { %3316 = vmatpush3.bf16.msra.mxu0 %v3693_v51  ;;  %v3740_v32 = vld [vmem:[%s4105_s14 + $0x1b8] sm:$0xff]   ;;  %v3747_v37 = vld [vmem:[%s4105_s14 + $0x240] sm:$0xff]   ;;  %v3751_v41 = vld [vmem:[%s4105_s14 + $0x248] sm:$0xff]  }
  0x4b   : > { %3338 = vmatpush3.bf16.msra.mxu1 %v3694_v52  ;;  %3317 = vmatprep.subr.bf16.mxu0 %v3695_v53  ;;  %v3744_v35 = vld [vmem:[%s4107_s15 + $0x18] ss:$112 sps:$4 sm:$0xff]   ;;  %v3746_v36 = vld [vmem:[%s4107_s15 + $0x1c] ss:$112 sps:$4 sm:$0xff]   ;;  %v3748_v38 = vld [vmem:[%s4105_s14 + $0x2c0] sm:$0xff]  }
  0x4c   : > { %3339 = vmatprep.subr.bf16.mxu1 %v3696_v54  ;;  %v3749_v39 = vld [vmem:[%s4105_s14 + $0x200] sm:$0xff]   ;;  %v3752_v42 = vld [vmem:[%s4105_s14 + $0x2c8] sm:$0xff]   ;;  %v3755_v45 = vld [vmem:[%s4105_s14 + $0x250] sm:$0xff]  }
  0x4d   : > { %v3750_v40 = vld [vmem:[%s4105_s14 + $0x280] sm:$0xff]   ;;  %v3753_v43 = vld [vmem:[%s4105_s14 + $0x208] sm:$0xff]   ;;  %v3756_v46 = vld [vmem:[%s4105_s14 + $0x2d0] sm:$0xff]  }
  0x4e   : > { %3318 = vmatpush3.bf16.msra.mxu0 %v3697_v55  ;;  %v3754_v44 = vld [vmem:[%s4105_s14 + $0x288] sm:$0xff]   ;;  %v3757_v47 = vld [vmem:[%s4105_s14 + $0x210] sm:$0xff]   ;;  %v3759_v49 = vld [vmem:[%s4105_s14 + $0x258] sm:$0xff]  }
  0x4f   : > { %3340 = vmatpush3.bf16.msra.mxu1 %v3698_v56  ;;  %3319 = vmatprep.subr.bf16.mxu0 %v3699_v57  ;;  %v3758_v48 = vld [vmem:[%s4105_s14 + $0x290] sm:$0xff]   ;;  %v3760_v50 = vld [vmem:[%s4105_s14 + $0x2d8] sm:$0xff]   ;;  %v3763_v53 = vld [vmem:[%s4105_s14 + $0x260] sm:$0xff]  }
  0x50   : > { %3341 = vmatprep.subr.bf16.mxu1 %v3700_v58  ;;  %v3761_v51 = vld [vmem:[%s4105_s14 + $0x218] sm:$0xff]   ;;  %v3764_v54 = vld [vmem:[%s4105_s14 + $0x2e0] sm:$0xff]   ;;  %v3767_v57 = vld [vmem:[%s4105_s14 + $0x268] sm:$0xff]  }
  0x51   : > { %v3762_v52 = vld [vmem:[%s4105_s14 + $0x298] sm:$0xff]   ;;  %v3765_v55 = vld [vmem:[%s4105_s14 + $0x220] sm:$0xff]   ;;  %v3768_v58 = vld [vmem:[%s4105_s14 + $0x2e8] sm:$0xff]  }
  0x52   : > { %3320 = vmatpush3.bf16.msra.mxu0 %v3701_v59  ;;  %v3766_v56 = vld [vmem:[%s4105_s14 + $0x2a0] sm:$0xff]   ;;  %v3769_v59 = vld [vmem:[%s4105_s14 + $0x228] sm:$0xff]   ;;  %v3772_v62 = vld [vmem:[%s4105_s14 + $0x2f0] sm:$0xff]  }
  0x53   : > { %3342 = vmatpush3.bf16.msra.mxu1 %v3702_v60  ;;  %3349 = vmatprep.subr.bf16.mxu0 %v3709_v1  ;;  %v3770_v60 = vld [vmem:[%s4105_s14 + $0x2a8] sm:$0xff]   ;;  %v3774_v0 = vld [vmem:[%s4105_s14 + $0x2b0] sm:$0xff]   ;;  %v3775_v1 = vld [vmem:[%s4105_s14 + $0x278] sm:$0xff]  }
  0x54   : > { %3371 = vmatprep.subr.bf16.mxu1 %v3710_v2  ;;  %v3776_v2 = vld [vmem:[%s4105_s14 + $0x2f8] sm:$0xff]  }
  0x55   : > { %2309 = vmatmul.mubr.bf16.vlgmr.msra.gmra.mrb[0].mxu0 %v3703_v61  ;;  %v3771_v61 = vld [vmem:[%s4105_s14 + $0x270] sm:$0xff]  }
  0x56   : > { %2350 = vmatmul.mubr.bf16.vlgmr.msra.gmra.mrb[0].mxu1 %v3706_v63  ;;  %3350 = vmatpush3.bf16.msra.mxu0 %v3711_v3  ;;  %v3773_v63 = vld [vmem:[%s4105_s14 + $0x230] sm:$0xff]   ;;  %v3777_v3 = vld [vmem:[%s4105_s14 + $0x238] sm:$0xff]  }
  0x57   : > { %3372 = vmatpush3.bf16.msra.mxu1 %v3712_v4  ;;  %3351 = vmatprep.subr.bf16.mxu0 %v3713_v5  ;;  %v3778_v4 = vld [vmem:[%s4105_s14 + $0x2b8] sm:$0xff]   ;;  %v3779_v5 = vld [vmem:[%s4107_s15 + $0x20] ss:$112 sps:$4 sm:$0xff]  }
  0x58   : > { %3373 = vmatprep.subr.bf16.mxu1 %v3714_v6  ;;  %2390 = vmatprep.mubr.bf16.mxu0 %v3743_v34  ;;  %v3781_v6 = vld [vmem:[%s4107_s15 + $0x24] ss:$112 sps:$4 sm:$0xff]  }
  0x59   : > { %2431 = vmatprep.mubr.bf16.mxu1 %v3746_v36  ;;  %v3810_v34 = vld [vmem:[%s4105_s14 + $0x3f0] sm:$0xff]  }
  0x5a   : > { %3352 = vmatpush3.bf16.msra.mxu0 %v3715_v7  ;;  %v3782_v7 = vld [vmem:[%s4107_s15 + $0x28] ss:$112 sps:$4 sm:$0xff]   ;;  %v3812_v36 = vld [vmem:[%s4105_s14 + $0x3b0] sm:$0xff]  }
  0x5b   : > { %3374 = vmatpush3.bf16.msra.mxu1 %v3716_v8  ;;  %3353 = vmatprep.subr.bf16.mxu0 %v3717_v9  ;;  %v3784_v8 = vld [vmem:[%s4107_s15 + $0x2c] ss:$112 sps:$4 sm:$0xff]   ;;  %v3785_v9 = vld [vmem:[%s4105_s14 + $0x340] sm:$0xff]  }
  0x5c   : > { %3375 = vmatprep.subr.bf16.mxu1 %v3718_v10  ;;  %v3786_v10 = vld [vmem:[%s4105_s14 + $0x3c0] sm:$0xff]  }
  0x5e   : > { %3354 = vmatpush3.bf16.msra.mxu0 %v3719_v11  ;;  %v3787_v11 = vld [vmem:[%s4105_s14 + $0x300] sm:$0xff]  }
  0x5f   : > { %3376 = vmatpush3.bf16.msra.mxu1 %v3720_v12  ;;  %3355 = vmatprep.subr.bf16.mxu0 %v3721_v13  ;;  %v3788_v12 = vld [vmem:[%s4105_s14 + $0x380] sm:$0xff]   ;;  %v3789_v13 = vld [vmem:[%s4105_s14 + $0x348] sm:$0xff]  }
  0x60   : > { %3377 = vmatprep.subr.bf16.mxu1 %v3722_v14  ;;  %v3790_v14 = vld [vmem:[%s4105_s14 + $0x3c8] sm:$0xff]  }
  0x62   : > { %3356 = vmatpush3.bf16.msra.mxu0 %v3723_v15  ;;  %v3791_v15 = vld [vmem:[%s4105_s14 + $0x308] sm:$0xff]  }
  0x63   : > { %3378 = vmatpush3.bf16.msra.mxu1 %v3724_v16  ;;  %3357 = vmatprep.subr.bf16.mxu0 %v3725_v17  ;;  %v3792_v16 = vld [vmem:[%s4105_s14 + $0x388] sm:$0xff]   ;;  %v3793_v17 = vld [vmem:[%s4105_s14 + $0x350] sm:$0xff]  }
  0x64   : > { %3379 = vmatprep.subr.bf16.mxu1 %v3726_v18  ;;  %v3794_v18 = vld [vmem:[%s4105_s14 + $0x3d0] sm:$0xff]  }
  0x66   : > { %3358 = vmatpush3.bf16.msra.mxu0 %v3727_v19  ;;  %v3795_v19 = vld [vmem:[%s4105_s14 + $0x310] sm:$0xff]  }
  0x67   : > { %3380 = vmatpush3.bf16.msra.mxu1 %v3728_v20  ;;  %3359 = vmatprep.subr.bf16.mxu0 %v3729_v21  ;;  %v3796_v20 = vld [vmem:[%s4105_s14 + $0x390] sm:$0xff]   ;;  %v3797_v21 = vld [vmem:[%s4105_s14 + $0x358] sm:$0xff]  }
  0x68   : > { %3381 = vmatprep.subr.bf16.mxu1 %v3730_v22  ;;  %v3798_v22 = vld [vmem:[%s4105_s14 + $0x3d8] sm:$0xff]  }
  0x6a   : > { %3360 = vmatpush3.bf16.msra.mxu0 %v3731_v23  ;;  %v3799_v23 = vld [vmem:[%s4105_s14 + $0x318] sm:$0xff]  }
  0x6b   : > { %3382 = vmatpush3.bf16.msra.mxu1 %v3732_v24  ;;  %3361 = vmatprep.subr.bf16.mxu0 %v3733_v25  ;;  %v3800_v24 = vld [vmem:[%s4105_s14 + $0x398] sm:$0xff]   ;;  %v3801_v25 = vld [vmem:[%s4105_s14 + $0x360] sm:$0xff]  }
  0x6c   : > { %3383 = vmatprep.subr.bf16.mxu1 %v3734_v26  ;;  %v3802_v26 = vld [vmem:[%s4105_s14 + $0x3e0] sm:$0xff]  }
  0x6e   : > { %3362 = vmatpush3.bf16.msra.mxu0 %v3735_v27  ;;  %v3803_v27 = vld [vmem:[%s4105_s14 + $0x320] sm:$0xff]  }
  0x6f   : > { %3384 = vmatpush3.bf16.msra.mxu1 %v3736_v28  ;;  %3363 = vmatprep.subr.bf16.mxu0 %v3737_v29  ;;  %v3804_v28 = vld [vmem:[%s4105_s14 + $0x3a0] sm:$0xff]   ;;  %v3805_v29 = vld [vmem:[%s4105_s14 + $0x368] sm:$0xff]  }
  0x70   : > { %3385 = vmatprep.subr.bf16.mxu1 %v3738_v30  ;;  %v3806_v30 = vld [vmem:[%s4105_s14 + $0x3e8] sm:$0xff]  }
  0x72   : > { %3364 = vmatpush3.bf16.msra.mxu0 %v3739_v31  ;;  %v3807_v31 = vld [vmem:[%s4105_s14 + $0x328] sm:$0xff]  }
  0x73   : > { %3386 = vmatpush3.bf16.msra.mxu1 %v3740_v32  ;;  %3393 = vmatprep.subr.bf16.mxu0 %v3747_v37  ;;  %v3808_v32 = vld [vmem:[%s4105_s14 + $0x3a8] sm:$0xff]   ;;  %v3813_v37 = vld [vmem:[%s4105_s14 + $0x378] sm:$0xff]  }
  0x74   : > { %3415 = vmatprep.subr.bf16.mxu1 %v3748_v38  ;;  %v3814_v38 = vld [vmem:[%s4105_s14 + $0x3f8] sm:$0xff]  }
  0x75   : > { %2391 = vmatmul.mubr.bf16.vlgmr.msra.gmra.mrb[4].mxu0 %v3741_v33  ;;  %v3809_v33 = vld [vmem:[%s4105_s14 + $0x370] sm:$0xff]  }
  0x76   : > { %2432 = vmatmul.mubr.bf16.vlgmr.msra.gmra.mrb[4].mxu1 %v3744_v35  ;;  %3394 = vmatpush3.bf16.msra.mxu0 %v3749_v39  ;;  %v3811_v35 = vld [vmem:[%s4105_s14 + $0x330] sm:$0xff]   ;;  %v3815_v39 = vld [vmem:[%s4105_s14 + $0x338] sm:$0xff]  }
  0x77   : > { %3416 = vmatpush3.bf16.msra.mxu1 %v3750_v40  ;;  %3395 = vmatprep.subr.bf16.mxu0 %v3751_v41  ;;  %v3816_v40 = vld [vmem:[%s4105_s14 + $0x3b8] sm:$0xff]   ;;  %v3817_v41 = vld [vmem:[%s4107_s15 + $0x30] ss:$112 sps:$4 sm:$0xff]  }
  0x78   : > { %3417 = vmatprep.subr.bf16.mxu1 %v3752_v42  ;;  %2472 = vmatprep.mubr.bf16.mxu0 %v3781_v6  ;;  %v3819_v42 = vld [vmem:[%s4107_s15 + $0x34] ss:$112 sps:$4 sm:$0xff]  }
  0x79   : > { %2513 = vmatprep.mubr.bf16.mxu1 %v3784_v8  ;;  %v3848_v6 = vld [vmem:[%s4105_s14 + $0x4f0] sm:$0xff]  }
  0x7a   : > { %3396 = vmatpush3.bf16.msra.mxu0 %v3753_v43  ;;  %v3820_v43 = vld [vmem:[%s4107_s15 + $0x38] ss:$112 sps:$4 sm:$0xff]   ;;  %v3850_v8 = vld [vmem:[%s4105_s14 + $0x4b0] sm:$0xff]  }
  0x7b   : > { %3418 = vmatpush3.bf16.msra.mxu1 %v3754_v44  ;;  %3397 = vmatprep.subr.bf16.mxu0 %v3755_v45  ;;  %v3822_v44 = vld [vmem:[%s4107_s15 + $0x3c] ss:$112 sps:$4 sm:$0xff]   ;;  %v3823_v45 = vld [vmem:[%s4105_s14 + $0x440] sm:$0xff]  }
  0x7c   : > { %3419 = vmatprep.subr.bf16.mxu1 %v3756_v46  ;;  %v3824_v46 = vld [vmem:[%s4105_s14 + $0x4c0] sm:$0xff]  }
  0x7e   : > { %3398 = vmatpush3.bf16.msra.mxu0 %v3757_v47  ;;  %v3825_v47 = vld [vmem:[%s4105_s14 + $0x400] sm:$0xff]  }
  0x7f   : > { %3420 = vmatpush3.bf16.msra.mxu1 %v3758_v48  ;;  %3399 = vmatprep.subr.bf16.mxu0 %v3759_v49  ;;  %v3826_v48 = vld [vmem:[%s4105_s14 + $0x480] sm:$0xff]   ;;  %v3827_v49 = vld [vmem:[%s4105_s14 + $0x448] sm:$0xff]  }
  0x80   : > { %3421 = vmatprep.subr.bf16.mxu1 %v3760_v50  ;;  %v3828_v50 = vld [vmem:[%s4105_s14 + $0x4c8] sm:$0xff]  }
  0x82   : > { %3400 = vmatpush3.bf16.msra.mxu0 %v3761_v51  ;;  %v3829_v51 = vld [vmem:[%s4105_s14 + $0x408] sm:$0xff]  }
  0x83   : > { %3422 = vmatpush3.bf16.msra.mxu1 %v3762_v52  ;;  %3401 = vmatprep.subr.bf16.mxu0 %v3763_v53  ;;  %v3830_v52 = vld [vmem:[%s4105_s14 + $0x488] sm:$0xff]   ;;  %v3831_v53 = vld [vmem:[%s4105_s14 + $0x450] sm:$0xff]  }
  0x84   : > { %3423 = vmatprep.subr.bf16.mxu1 %v3764_v54  ;;  %v3832_v54 = vld [vmem:[%s4105_s14 + $0x4d0] sm:$0xff]  }
  0x86   : > { %3402 = vmatpush3.bf16.msra.mxu0 %v3765_v55  ;;  %v3833_v55 = vld [vmem:[%s4105_s14 + $0x410] sm:$0xff]  }
  0x87   : > { %3424 = vmatpush3.bf16.msra.mxu1 %v3766_v56  ;;  %3403 = vmatprep.subr.bf16.mxu0 %v3767_v57  ;;  %v3834_v56 = vld [vmem:[%s4105_s14 + $0x490] sm:$0xff]   ;;  %v3835_v57 = vld [vmem:[%s4105_s14 + $0x458] sm:$0xff]  }
  0x88   : > { %3425 = vmatprep.subr.bf16.mxu1 %v3768_v58  ;;  %v3836_v58 = vld [vmem:[%s4105_s14 + $0x4d8] sm:$0xff]  }
  0x8a   : > { %3404 = vmatpush3.bf16.msra.mxu0 %v3769_v59  ;;  %v3837_v59 = vld [vmem:[%s4105_s14 + $0x418] sm:$0xff]  }
  0x8b   : > { %3426 = vmatpush3.bf16.msra.mxu1 %v3770_v60  ;;  %3405 = vmatprep.subr.bf16.mxu0 %v3771_v61  ;;  %v3838_v60 = vld [vmem:[%s4105_s14 + $0x498] sm:$0xff]   ;;  %v3839_v61 = vld [vmem:[%s4105_s14 + $0x460] sm:$0xff]  }
  0x8c   : > { %3427 = vmatprep.subr.bf16.mxu1 %v3772_v62  ;;  %v3840_v62 = vld [vmem:[%s4105_s14 + $0x4e0] sm:$0xff]  }
  0x8e   : > { %3406 = vmatpush3.bf16.msra.mxu0 %v3773_v63  ;;  %v3841_v63 = vld [vmem:[%s4105_s14 + $0x420] sm:$0xff]  }
  0x8f   : > { %3428 = vmatpush3.bf16.msra.mxu1 %v3774_v0  ;;  %3407 = vmatprep.subr.bf16.mxu0 %v3775_v1  ;;  %v3842_v0 = vld [vmem:[%s4105_s14 + $0x4a0] sm:$0xff]   ;;  %v3843_v1 = vld [vmem:[%s4105_s14 + $0x468] sm:$0xff]  }
  0x90   : > { %3429 = vmatprep.subr.bf16.mxu1 %v3776_v2  ;;  %v3844_v2 = vld [vmem:[%s4105_s14 + $0x4e8] sm:$0xff]  }
  0x92   : > { %3408 = vmatpush3.bf16.msra.mxu0 %v3777_v3  ;;  %v3845_v3 = vld [vmem:[%s4105_s14 + $0x428] sm:$0xff]  }
  0x93   : > { %3430 = vmatpush3.bf16.msra.mxu1 %v3778_v4  ;;  %3437 = vmatprep.subr.bf16.mxu0 %v3785_v9  ;;  %v3846_v4 = vld [vmem:[%s4105_s14 + $0x4a8] sm:$0xff]   ;;  %v3851_v9 = vld [vmem:[%s4105_s14 + $0x478] sm:$0xff]  }
  0x94   : > { %3459 = vmatprep.subr.bf16.mxu1 %v3786_v10  ;;  %v3852_v10 = vld [vmem:[%s4105_s14 + $0x4f8] sm:$0xff]  }
  0x95   : > { %2473 = vmatmul.mubr.bf16.vlgmr.msra.gmra.mrb[8].mxu0 %v3779_v5  ;;  %v3847_v5 = vld [vmem:[%s4105_s14 + $0x470] sm:$0xff]  }
  0x96   : > { %2514 = vmatmul.mubr.bf16.vlgmr.msra.gmra.mrb[8].mxu1 %v3782_v7  ;;  %3438 = vmatpush3.bf16.msra.mxu0 %v3787_v11  ;;  %v3849_v7 = vld [vmem:[%s4105_s14 + $0x430] sm:$0xff]   ;;  %v3853_v11 = vld [vmem:[%s4105_s14 + $0x438] sm:$0xff]  }
  0x97   : > { %3460 = vmatpush3.bf16.msra.mxu1 %v3788_v12  ;;  %3439 = vmatprep.subr.bf16.mxu0 %v3789_v13  ;;  %v3854_v12 = vld [vmem:[%s4105_s14 + $0x4b8] sm:$0xff]   ;;  %v3855_v13 = vld [vmem:[%s4107_s15 + $0x40] ss:$112 sps:$4 sm:$0xff]  }
  0x98   : > { %3461 = vmatprep.subr.bf16.mxu1 %v3790_v14  ;;  %2554 = vmatprep.mubr.bf16.mxu0 %v3819_v42  ;;  %v3857_v14 = vld [vmem:[%s4107_s15 + $0x44] ss:$112 sps:$4 sm:$0xff]  }
  0x99   : > { %2595 = vmatprep.mubr.bf16.mxu1 %v3822_v44  ;;  %v3886_v42 = vld [vmem:[%s4105_s14 + $0x5f0] sm:$0xff]  }
  0x9a   : > { %3440 = vmatpush3.bf16.msra.mxu0 %v3791_v15  ;;  %v3858_v15 = vld [vmem:[%s4107_s15 + $0x48] ss:$112 sps:$4 sm:$0xff]   ;;  %v3888_v44 = vld [vmem:[%s4105_s14 + $0x5b0] sm:$0xff]  }
  0x9b   : > { %3462 = vmatpush3.bf16.msra.mxu1 %v3792_v16  ;;  %3441 = vmatprep.subr.bf16.mxu0 %v3793_v17  ;;  %v3860_v16 = vld [vmem:[%s4107_s15 + $0x4c] ss:$112 sps:$4 sm:$0xff]   ;;  %v3861_v17 = vld [vmem:[%s4105_s14 + $0x540] sm:$0xff]  }
  0x9c   : > { %3463 = vmatprep.subr.bf16.mxu1 %v3794_v18  ;;  %v3862_v18 = vld [vmem:[%s4105_s14 + $0x5c0] sm:$0xff]  }
  0x9e   : > { %3442 = vmatpush3.bf16.msra.mxu0 %v3795_v19  ;;  %v3863_v19 = vld [vmem:[%s4105_s14 + $0x500] sm:$0xff]  }
  0x9f   : > { %3464 = vmatpush3.bf16.msra.mxu1 %v3796_v20  ;;  %3443 = vmatprep.subr.bf16.mxu0 %v3797_v21  ;;  %v3864_v20 = vld [vmem:[%s4105_s14 + $0x580] sm:$0xff]   ;;  %v3865_v21 = vld [vmem:[%s4105_s14 + $0x548] sm:$0xff]  }
  0xa0   : > { %3465 = vmatprep.subr.bf16.mxu1 %v3798_v22  ;;  %v3866_v22 = vld [vmem:[%s4105_s14 + $0x5c8] sm:$0xff]  }
  0xa2   : > { %3444 = vmatpush3.bf16.msra.mxu0 %v3799_v23  ;;  %v3867_v23 = vld [vmem:[%s4105_s14 + $0x508] sm:$0xff]  }
  0xa3   : > { %3466 = vmatpush3.bf16.msra.mxu1 %v3800_v24  ;;  %3445 = vmatprep.subr.bf16.mxu0 %v3801_v25  ;;  %v3868_v24 = vld [vmem:[%s4105_s14 + $0x588] sm:$0xff]   ;;  %v3869_v25 = vld [vmem:[%s4105_s14 + $0x550] sm:$0xff]  }
  0xa4   : > { %3467 = vmatprep.subr.bf16.mxu1 %v3802_v26  ;;  %v3870_v26 = vld [vmem:[%s4105_s14 + $0x5d0] sm:$0xff]  }
  0xa6   : > { %3446 = vmatpush3.bf16.msra.mxu0 %v3803_v27  ;;  %v3871_v27 = vld [vmem:[%s4105_s14 + $0x510] sm:$0xff]  }
  0xa7   : > { %3468 = vmatpush3.bf16.msra.mxu1 %v3804_v28  ;;  %3447 = vmatprep.subr.bf16.mxu0 %v3805_v29  ;;  %v3872_v28 = vld [vmem:[%s4105_s14 + $0x590] sm:$0xff]   ;;  %v3873_v29 = vld [vmem:[%s4105_s14 + $0x558] sm:$0xff]  }
  0xa8   : > { %3469 = vmatprep.subr.bf16.mxu1 %v3806_v30  ;;  %v3874_v30 = vld [vmem:[%s4105_s14 + $0x5d8] sm:$0xff]  }
  0xaa   : > { %3448 = vmatpush3.bf16.msra.mxu0 %v3807_v31  ;;  %v3875_v31 = vld [vmem:[%s4105_s14 + $0x518] sm:$0xff]  }
  0xab   : > { %3470 = vmatpush3.bf16.msra.mxu1 %v3808_v32  ;;  %3449 = vmatprep.subr.bf16.mxu0 %v3809_v33  ;;  %v3876_v32 = vld [vmem:[%s4105_s14 + $0x598] sm:$0xff]   ;;  %v3877_v33 = vld [vmem:[%s4105_s14 + $0x560] sm:$0xff]  }
  0xac   : > { %3471 = vmatprep.subr.bf16.mxu1 %v3810_v34  ;;  %v3878_v34 = vld [vmem:[%s4105_s14 + $0x5e0] sm:$0xff]  }
  0xae   : > { %3450 = vmatpush3.bf16.msra.mxu0 %v3811_v35  ;;  %v3879_v35 = vld [vmem:[%s4105_s14 + $0x520] sm:$0xff]  }
  0xaf   : > { %3472 = vmatpush3.bf16.msra.mxu1 %v3812_v36  ;;  %3451 = vmatprep.subr.bf16.mxu0 %v3813_v37  ;;  %v3880_v36 = vld [vmem:[%s4105_s14 + $0x5a0] sm:$0xff]   ;;  %v3881_v37 = vld [vmem:[%s4105_s14 + $0x568] sm:$0xff]  }
  0xb0   : > { %3473 = vmatprep.subr.bf16.mxu1 %v3814_v38  ;;  %v3882_v38 = vld [vmem:[%s4105_s14 + $0x5e8] sm:$0xff]  }
  0xb2   : > { %3452 = vmatpush3.bf16.msra.mxu0 %v3815_v39  ;;  %v3883_v39 = vld [vmem:[%s4105_s14 + $0x528] sm:$0xff]  }
  0xb3   : > { %3474 = vmatpush3.bf16.msra.mxu1 %v3816_v40  ;;  %3481 = vmatprep.subr.bf16.mxu0 %v3823_v45  ;;  %v3884_v40 = vld [vmem:[%s4105_s14 + $0x5a8] sm:$0xff]   ;;  %v3889_v45 = vld [vmem:[%s4105_s14 + $0x578] sm:$0xff]  }
  0xb4   : > { %3503 = vmatprep.subr.bf16.mxu1 %v3824_v46  ;;  %v3890_v46 = vld [vmem:[%s4105_s14 + $0x5f8] sm:$0xff]  }
  0xb5   : > { %2555 = vmatmul.mubr.bf16.vlgmr.msra.gmra.mrb[12].mxu0 %v3817_v41  ;;  %v3885_v41 = vld [vmem:[%s4105_s14 + $0x570] sm:$0xff]  }
  0xb6   : > { %2596 = vmatmul.mubr.bf16.vlgmr.msra.gmra.mrb[12].mxu1 %v3820_v43  ;;  %3482 = vmatpush3.bf16.msra.mxu0 %v3825_v47  ;;  %v3887_v43 = vld [vmem:[%s4105_s14 + $0x530] sm:$0xff]   ;;  %v3891_v47 = vld [vmem:[%s4105_s14 + $0x538] sm:$0xff]  }
  0xb7   : > { %3504 = vmatpush3.bf16.msra.mxu1 %v3826_v48  ;;  %3483 = vmatprep.subr.bf16.mxu0 %v3827_v49  ;;  %v3892_v48 = vld [vmem:[%s4105_s14 + $0x5b8] sm:$0xff]   ;;  %v3893_v49 = vld [vmem:[%s4107_s15 + $0x50] ss:$112 sps:$4 sm:$0xff]  }
  0xb8   : > { %3505 = vmatprep.subr.bf16.mxu1 %v3828_v50  ;;  %2636 = vmatprep.mubr.bf16.mxu0 %v3857_v14  ;;  %v3895_v50 = vld [vmem:[%s4107_s15 + $0x54] ss:$112 sps:$4 sm:$0xff]  }
  0xb9   : > { %2677 = vmatprep.mubr.bf16.mxu1 %v3860_v16  ;;  %v3924_v14 = vld [vmem:[%s4105_s14 + $0x6f0] sm:$0xff]  }
  0xba   : > { %3484 = vmatpush3.bf16.msra.mxu0 %v3829_v51  ;;  %v3896_v51 = vld [vmem:[%s4107_s15 + $0x58] ss:$112 sps:$4 sm:$0xff]   ;;  %v3926_v16 = vld [vmem:[%s4105_s14 + $0x6b0] sm:$0xff]  }
  0xbb   : > { %3506 = vmatpush3.bf16.msra.mxu1 %v3830_v52  ;;  %3485 = vmatprep.subr.bf16.mxu0 %v3831_v53  ;;  %v3898_v52 = vld [vmem:[%s4107_s15 + $0x5c] ss:$112 sps:$4 sm:$0xff]   ;;  %v3899_v53 = vld [vmem:[%s4105_s14 + $0x640] sm:$0xff]  }
  0xbc   : > { %3507 = vmatprep.subr.bf16.mxu1 %v3832_v54  ;;  %v3900_v54 = vld [vmem:[%s4105_s14 + $0x6c0] sm:$0xff]  }
  0xbe   : > { %3486 = vmatpush3.bf16.msra.mxu0 %v3833_v55  ;;  %v3901_v55 = vld [vmem:[%s4105_s14 + $0x600] sm:$0xff]  }
  0xbf   : > { %3508 = vmatpush3.bf16.msra.mxu1 %v3834_v56  ;;  %3487 = vmatprep.subr.bf16.mxu0 %v3835_v57  ;;  %v3902_v56 = vld [vmem:[%s4105_s14 + $0x680] sm:$0xff]   ;;  %v3903_v57 = vld [vmem:[%s4105_s14 + $0x648] sm:$0xff]  }
  0xc0   : > { %3509 = vmatprep.subr.bf16.mxu1 %v3836_v58  ;;  %v3904_v58 = vld [vmem:[%s4105_s14 + $0x6c8] sm:$0xff]  }
  0xc2   : > { %3488 = vmatpush3.bf16.msra.mxu0 %v3837_v59  ;;  %v3905_v59 = vld [vmem:[%s4105_s14 + $0x608] sm:$0xff]  }
  0xc3   : > { %3510 = vmatpush3.bf16.msra.mxu1 %v3838_v60  ;;  %3489 = vmatprep.subr.bf16.mxu0 %v3839_v61  ;;  %v3906_v60 = vld [vmem:[%s4105_s14 + $0x688] sm:$0xff]   ;;  %v3907_v61 = vld [vmem:[%s4105_s14 + $0x650] sm:$0xff]  }
  0xc4   : > { %3511 = vmatprep.subr.bf16.mxu1 %v3840_v62  ;;  %v3908_v62 = vld [vmem:[%s4105_s14 + $0x6d0] sm:$0xff]  }
  0xc6   : > { %3490 = vmatpush3.bf16.msra.mxu0 %v3841_v63  ;;  %v3909_v63 = vld [vmem:[%s4105_s14 + $0x610] sm:$0xff]  }
  0xc7   : > { %3512 = vmatpush3.bf16.msra.mxu1 %v3842_v0  ;;  %3491 = vmatprep.subr.bf16.mxu0 %v3843_v1  ;;  %v3910_v0 = vld [vmem:[%s4105_s14 + $0x690] sm:$0xff]   ;;  %v3911_v1 = vld [vmem:[%s4105_s14 + $0x658] sm:$0xff]  }
  0xc8   : > { %3513 = vmatprep.subr.bf16.mxu1 %v3844_v2  ;;  %v3912_v2 = vld [vmem:[%s4105_s14 + $0x6d8] sm:$0xff]  }
  0xca   : > { %3492 = vmatpush3.bf16.msra.mxu0 %v3845_v3  ;;  %v3913_v3 = vld [vmem:[%s4105_s14 + $0x618] sm:$0xff]  }
  0xcb   : > { %3514 = vmatpush3.bf16.msra.mxu1 %v3846_v4  ;;  %3493 = vmatprep.subr.bf16.mxu0 %v3847_v5  ;;  %v3914_v4 = vld [vmem:[%s4105_s14 + $0x698] sm:$0xff]   ;;  %v3915_v5 = vld [vmem:[%s4105_s14 + $0x660] sm:$0xff]  }
  0xcc   : > { %3515 = vmatprep.subr.bf16.mxu1 %v3848_v6  ;;  %v3916_v6 = vld [vmem:[%s4105_s14 + $0x6e0] sm:$0xff]  }
  0xce   : > { %3494 = vmatpush3.bf16.msra.mxu0 %v3849_v7  ;;  %v3917_v7 = vld [vmem:[%s4105_s14 + $0x620] sm:$0xff]  }
  0xcf   : > { %3516 = vmatpush3.bf16.msra.mxu1 %v3850_v8  ;;  %3495 = vmatprep.subr.bf16.mxu0 %v3851_v9  ;;  %v3918_v8 = vld [vmem:[%s4105_s14 + $0x6a0] sm:$0xff]   ;;  %v3919_v9 = vld [vmem:[%s4105_s14 + $0x668] sm:$0xff]  }
  0xd0   : > { %3517 = vmatprep.subr.bf16.mxu1 %v3852_v10  ;;  %v3920_v10 = vld [vmem:[%s4105_s14 + $0x6e8] sm:$0xff]  }
  0xd2   : > { %3496 = vmatpush3.bf16.msra.mxu0 %v3853_v11  ;;  %v3921_v11 = vld [vmem:[%s4105_s14 + $0x628] sm:$0xff]  }
  0xd3   : > { %3518 = vmatpush3.bf16.msra.mxu1 %v3854_v12  ;;  %3525 = vmatprep.subr.bf16.mxu0 %v3861_v17  ;;  %v3922_v12 = vld [vmem:[%s4105_s14 + $0x6a8] sm:$0xff]   ;;  %v3927_v17 = vld [vmem:[%s4105_s14 + $0x678] sm:$0xff]  }
  0xd4   : > { %3547 = vmatprep.subr.bf16.mxu1 %v3862_v18  ;;  %v3928_v18 = vld [vmem:[%s4105_s14 + $0x6f8] sm:$0xff]  }
  0xd5   : > { %2637 = vmatmul.mubr.bf16.vlgmr.msra.gmra.mrb[16].mxu0 %v3855_v13  ;;  %v3923_v13 = vld [vmem:[%s4105_s14 + $0x670] sm:$0xff]  }
  0xd6   : > { %2678 = vmatmul.mubr.bf16.vlgmr.msra.gmra.mrb[16].mxu1 %v3858_v15  ;;  %3526 = vmatpush3.bf16.msra.mxu0 %v3863_v19  ;;  %v3925_v15 = vld [vmem:[%s4105_s14 + $0x630] sm:$0xff]   ;;  %v3929_v19 = vld [vmem:[%s4105_s14 + $0x638] sm:$0xff]  }
  0xd7   : > { %3548 = vmatpush3.bf16.msra.mxu1 %v3864_v20  ;;  %3527 = vmatprep.subr.bf16.mxu0 %v3865_v21  ;;  %v3930_v20 = vld [vmem:[%s4105_s14 + $0x6b8] sm:$0xff]   ;;  %v3931_v21 = vld [vmem:[%s4107_s15 + $0x60] ss:$112 sps:$4 sm:$0xff]  }
  0xd8   : > { %3549 = vmatprep.subr.bf16.mxu1 %v3866_v22  ;;  %2718 = vmatprep.mubr.bf16.mxu0 %v3895_v50  ;;  %v3933_v22 = vld [vmem:[%s4107_s15 + $0x64] ss:$112 sps:$4 sm:$0xff]  }
  0xd9   : > { %2759 = vmatprep.mubr.bf16.mxu1 %v3898_v52 }
  0xda   : > { %3528 = vmatpush3.bf16.msra.mxu0 %v3867_v23  ;;  %v3934_v23 = vld [vmem:[%s4107_s15 + $0x68] ss:$112 sps:$4 sm:$0xff]  }
  0xdb   : > { %3550 = vmatpush3.bf16.msra.mxu1 %v3868_v24  ;;  %3529 = vmatprep.subr.bf16.mxu0 %v3869_v25  ;;  %v3936_v24 = vld [vmem:[%s4107_s15 + $0x6c] ss:$112 sps:$4 sm:$0xff]  }
  0xdc   : > { %3551 = vmatprep.subr.bf16.mxu1 %v3870_v26 }
  0xde   : > { %3530 = vmatpush3.bf16.msra.mxu0 %v3871_v27 }
  0xdf   : > { %3552 = vmatpush3.bf16.msra.mxu1 %v3872_v28  ;;  %3531 = vmatprep.subr.bf16.mxu0 %v3873_v29 }
  0xe0   : > { %3553 = vmatprep.subr.bf16.mxu1 %v3874_v30 }
  0xe2   : > { %3532 = vmatpush3.bf16.msra.mxu0 %v3875_v31 }
  0xe3   : > { %3554 = vmatpush3.bf16.msra.mxu1 %v3876_v32  ;;  %3533 = vmatprep.subr.bf16.mxu0 %v3877_v33 }
  0xe4   : > { %3555 = vmatprep.subr.bf16.mxu1 %v3878_v34 }
  0xe6   : > { %3534 = vmatpush3.bf16.msra.mxu0 %v3879_v35 }
  0xe7   : > { %3556 = vmatpush3.bf16.msra.mxu1 %v3880_v36  ;;  %3535 = vmatprep.subr.bf16.mxu0 %v3881_v37 }
  0xe8   : > { %3557 = vmatprep.subr.bf16.mxu1 %v3882_v38 }
  0xea   : > { %3536 = vmatpush3.bf16.msra.mxu0 %v3883_v39 }
  0xeb   : > { %3558 = vmatpush3.bf16.msra.mxu1 %v3884_v40  ;;  %3537 = vmatprep.subr.bf16.mxu0 %v3885_v41 }
  0xec   : > { %3559 = vmatprep.subr.bf16.mxu1 %v3886_v42 }
  0xee   : > { %3538 = vmatpush3.bf16.msra.mxu0 %v3887_v43 }
  0xef   : > { %3560 = vmatpush3.bf16.msra.mxu1 %v3888_v44  ;;  %3539 = vmatprep.subr.bf16.mxu0 %v3889_v45 }
  0xf0   : > { %3561 = vmatprep.subr.bf16.mxu1 %v3890_v46 }
  0xf2   : > { %3540 = vmatpush3.bf16.msra.mxu0 %v3891_v47 }
  0xf3   : > { %3562 = vmatpush3.bf16.msra.mxu1 %v3892_v48  ;;  %3569 = vmatprep.subr.bf16.mxu0 %v3899_v53 }
  0xf4   : > { %3591 = vmatprep.subr.bf16.mxu1 %v3900_v54 }
  0xf5   : > { %2719 = vmatmul.mubr.bf16.vlgmr.msra.gmra.mrb[20].mxu0 %v3893_v49 }
  0xf6   : > { %2760 = vmatmul.mubr.bf16.vlgmr.msra.gmra.mrb[20].mxu1 %v3896_v51  ;;  %3570 = vmatpush3.bf16.msra.mxu0 %v3901_v55 }
  0xf7   : > { %3592 = vmatpush3.bf16.msra.mxu1 %v3902_v56  ;;  %3571 = vmatprep.subr.bf16.mxu0 %v3903_v57 }
  0xf8   : > { %3593 = vmatprep.subr.bf16.mxu1 %v3904_v58  ;;  %2800 = vmatprep.mubr.bf16.mxu0 %v3933_v22 }
  0xf9   : > { %2841 = vmatprep.mubr.bf16.mxu1 %v3936_v24 }
  0xfa   : > { %3572 = vmatpush3.bf16.msra.mxu0 %v3905_v59 }
  0xfb   : > { %3594 = vmatpush3.bf16.msra.mxu1 %v3906_v60  ;;  %3573 = vmatprep.subr.bf16.mxu0 %v3907_v61 }
  0xfc   : > { %3595 = vmatprep.subr.bf16.mxu1 %v3908_v62 }
  0xfe   : > { %3574 = vmatpush3.bf16.msra.mxu0 %v3909_v63 }
  0xff   : > { %3596 = vmatpush3.bf16.msra.mxu1 %v3910_v0  ;;  %3575 = vmatprep.subr.bf16.mxu0 %v3911_v1 }
 0x100   : > { %3597 = vmatprep.subr.bf16.mxu1 %v3912_v2 }
 0x102   : > { %3576 = vmatpush3.bf16.msra.mxu0 %v3913_v3 }
 0x103   : > { %3598 = vmatpush3.bf16.msra.mxu1 %v3914_v4  ;;  %3577 = vmatprep.subr.bf16.mxu0 %v3915_v5 }
 0x104   : > { %3599 = vmatprep.subr.bf16.mxu1 %v3916_v6 }
 0x106   : > { %3578 = vmatpush3.bf16.msra.mxu0 %v3917_v7 }
 0x107   : > { %3600 = vmatpush3.bf16.msra.mxu1 %v3918_v8  ;;  %3579 = vmatprep.subr.bf16.mxu0 %v3919_v9 }
 0x108   : > { %3601 = vmatprep.subr.bf16.mxu1 %v3920_v10 }
 0x10a   : > { %3580 = vmatpush3.bf16.msra.mxu0 %v3921_v11 }
 0x10b   : > { %3602 = vmatpush3.bf16.msra.mxu1 %v3922_v12  ;;  %3581 = vmatprep.subr.bf16.mxu0 %v3923_v13 }
 0x10c   : > { %3603 = vmatprep.subr.bf16.mxu1 %v3924_v14 }
 0x10e   : > { %3582 = vmatpush3.bf16.msra.mxu0 %v3925_v15 }
 0x10f   : > { %3604 = vmatpush3.bf16.msra.mxu1 %v3926_v16  ;;  %3583 = vmatprep.subr.bf16.mxu0 %v3927_v17 }
 0x110   : > { %3605 = vmatprep.subr.bf16.mxu1 %v3928_v18 }
 0x112   : > { %3584 = vmatpush3.bf16.msra.mxu0 %v3929_v19 }
 0x113   : > { %3606 = vmatpush3.bf16.msra.mxu1 %v3930_v20 }
 0x115   : > { %2801 = vmatmul.mubr.bf16.vlgmr.msra.gmra.mrb[24].mxu0 %v3931_v21 }
 0x116   : > { %2842 = vmatmul.mubr.bf16.vlgmr.msra.gmra.mrb[24].mxu1 %v3934_v23 }
 0x128   : > { %v3321_v25 = vpop.f32.mrb[0].mxu0 }
 0x129   : > { %v3343_v26 = vpop.f32.mrb[0].mxu1  ;;  %v3322_v27 = vpop.f32.mrb[1].mxu0 }
 0x12a   : > { %v3323_v28 = vadd.f32 %v3322_v27, %v3321_v25  ;;  %v3344_v29 = vpop.f32.mrb[1].mxu1  ;;  %v3324_v30 = vpop.f32.mrb[2].mxu0 }
 0x12b   : > { %v3345_v31 = vadd.f32 %v3344_v29, %v3343_v26  ;;  %v3346_v32 = vpop.f32.mrb[2].mxu1  ;;  %v3325_v33 = vpop.f32.mrb[3].mxu0 }
 0x12c   : > { %v3326_v34 = vadd.f32 %v3325_v33, %v3324_v30  ;;  %v3347_v35 = vpop.f32.mrb[3].mxu1 }
 0x12d   : > { %v2352_v36 = vadd.f32 %v3345_v31, %v3323_v28  ;;  %v3348_v37 = vadd.f32 %v3347_v35, %v3346_v32 }
 0x12f   : > { %v2355_v38 = vadd.f32 %v3348_v37, %v3326_v34 }
 0x148   : > { %v3365_v39 = vpop.f32.mrb[4].mxu0 }
 0x149   : > { %v3366_v40 = vpop.f32.mrb[5].mxu0  ;;  %v3387_v41 = vpop.f32.mrb[4].mxu1 }
 0x14a   : > { %v3367_v42 = vadd.f32 %v3366_v40, %v3365_v39  ;;  %v3368_v43 = vpop.f32.mrb[6].mxu0  ;;  %v3388_v44 = vpop.f32.mrb[5].mxu1 }
 0x14b   : > { %v3369_v45 = vpop.f32.mrb[7].mxu0  ;;  %v3389_v47 = vadd.f32 %v3388_v44, %v3387_v41  ;;  %v3390_v48 = vpop.f32.mrb[6].mxu1 }
 0x14c   : > { %v2393_v46 = vadd.f32 %v3367_v42, %v2352_v36  ;;  %v3370_v49 = vadd.f32 %v3369_v45, %v3368_v43  ;;  %v3391_v50 = vpop.f32.mrb[7].mxu1 }
 0x14d   : > { %v3392_v53 = vadd.f32 %v3391_v50, %v3390_v48 }
 0x14e   : > { %v2434_v51 = vadd.f32 %v3389_v47, %v2393_v46  ;;  %v2396_v52 = vadd.f32 %v3370_v49, %v2355_v38 }
 0x150   : > { %v2437_v54 = vadd.f32 %v3392_v53, %v2396_v52 }
 0x168   : > { %v3409_v55 = vpop.f32.mrb[8].mxu0 }
 0x169   : > { %v3431_v56 = vpop.f32.mrb[8].mxu1  ;;  %v3410_v57 = vpop.f32.mrb[9].mxu0 }
 0x16a   : > { %v3411_v58 = vadd.f32 %v3410_v57, %v3409_v55  ;;  %v3432_v59 = vpop.f32.mrb[9].mxu1  ;;  %v3412_v60 = vpop.f32.mrb[10].mxu0 }
 0x16b   : > { %v3433_v61 = vadd.f32 %v3432_v59, %v3431_v56  ;;  %v3434_v62 = vpop.f32.mrb[10].mxu1  ;;  %v3413_v63 = vpop.f32.mrb[11].mxu0 }
 0x16c   : > { %v2475_v0 = vadd.f32 %v3411_v58, %v2434_v51  ;;  %v3414_v1 = vadd.f32 %v3413_v63, %v3412_v60  ;;  %v3435_v2 = vpop.f32.mrb[11].mxu1 }
 0x16d   : > { %v3436_v3 = vadd.f32 %v3435_v2, %v3434_v62 }
 0x16e   : > { %v2516_v4 = vadd.f32 %v3433_v61, %v2475_v0  ;;  %v2478_v5 = vadd.f32 %v3414_v1, %v2437_v54 }
 0x170   : > { %v2519_v6 = vadd.f32 %v3436_v3, %v2478_v5  ;;  %v314_v3 = vld [vmem:[#allocation2] sm:$0xff] }
 0x188   : > { %v3453_v7 = vpop.f32.mrb[12].mxu0 }
 0x189   : > { %v3475_v8 = vpop.f32.mrb[12].mxu1  ;;  %v3454_v9 = vpop.f32.mrb[13].mxu0 }
 0x18a   : > { %v3455_v10 = vadd.f32 %v3454_v9, %v3453_v7  ;;  %v3476_v11 = vpop.f32.mrb[13].mxu1  ;;  %v3456_v12 = vpop.f32.mrb[14].mxu0  ;;  %v315_v7 = vld [vmem:[#allocation2 + $0x8] sm:$0xff] }
 0x18b   : > { %v3477_v13 = vadd.f32 %v3476_v11, %v3475_v8  ;;  %v3478_v14 = vpop.f32.mrb[14].mxu1  ;;  %v3457_v15 = vpop.f32.mrb[15].mxu0  ;;  %v3937_v11 = vld [vmem:[%s4412_s3] sm:$0xff] (!%p3291_p10)  }
 0x18c   : > { %v2557_v16 = vadd.f32 %v3455_v10, %v2516_v4  ;;  %v3458_v17 = vadd.f32 %v3457_v15, %v3456_v12  ;;  %v3479_v18 = vpop.f32.mrb[15].mxu1  ;;  %v3970_v12 = vmov (!%p3291_p10), 0.0   ;;  %v3940_v15 = vld [vmem:[%s4412_s3 + $0x18] sm:$0xff] (!%p3291_p10)  }
 0x18d   : > { %v3480_v19 = vadd.f32 %v3479_v18, %v3478_v14  ;;  %3622 = vmatprep.subr.bf16.mxu0 (!%p3291_p10), %v3970_v12  ;;  %3638 = vmatprep.mubr.msk.bf16.mxu0 (!%p3291_p10), %vm3971_vm0, %v3970_v12  ;;  %v3939_v14 = vld [vmem:[%s4412_s3 + $0x10] sm:$0xff] (!%p3291_p10)  }
 0x18e   : > { %v2598_v20 = vadd.f32 %v3477_v13, %v2557_v16  ;;  %v2560_v21 = vadd.f32 %v3458_v17, %v2519_v6  ;;  %3623 = vmatpush3.bf16.msra.mxu0 (!%p3291_p10), %v3937_v11  ;;  %v3938_v13 = vld [vmem:[%s4412_s3 + $0x8] sm:$0xff] (!%p3291_p10)   ;;  %v3941_v16 = vld [vmem:[%s4412_s3 + $0x20] sm:$0xff] (!%p3291_p10)  }
 0x18f   : > { %3624 = vmatprep.subr.bf16.mxu0 (!%p3291_p10), %v3970_v12  ;;  %v3942_v17 = vld [vmem:[%s4412_s3 + $0x28] sm:$0xff] (!%p3291_p10)  }
 0x190   : > { %v2601_v22 = vadd.f32 %v3480_v19, %v2560_v21 }
 0x192   : > { %3625 = vmatpush3.bf16.msra.mxu0 (!%p3291_p10), %v3938_v13 }
 0x193   : > { %3626 = vmatprep.subr.bf16.mxu0 (!%p3291_p10), %v3970_v12 }
 0x196   : > { %3627 = vmatpush3.bf16.msra.mxu0 (!%p3291_p10), %v3939_v14 }
 0x197   : > { %3628 = vmatprep.subr.bf16.mxu0 (!%p3291_p10), %v3970_v12 }
 0x19a   : > { %3629 = vmatpush3.bf16.msra.mxu0 (!%p3291_p10), %v3940_v15 }
 0x19b   : > { %3630 = vmatprep.subr.bf16.mxu0 (!%p3291_p10), %v3970_v12 }
 0x19e   : > { %3631 = vmatpush3.bf16.msra.mxu0 (!%p3291_p10), %v3941_v16 }
 0x19f   : > { %3632 = vmatprep.subr.bf16.mxu0 (!%p3291_p10), %v3970_v12 }
 0x1a2   : > { %3633 = vmatpush3.bf16.msra.mxu0 (!%p3291_p10), %v3942_v17 }
 0x1a3   : > { %3634 = vmatprep.subr.bf16.mxu0 (!%p3291_p10), %v3970_v12 }
 0x1a8   : > { %v3497_v23 = vpop.f32.mrb[16].mxu0 }
 0x1a9   : > { %v3498_v24 = vpop.f32.mrb[17].mxu0  ;;  %v3519_v25 = vpop.f32.mrb[16].mxu1 }
 0x1aa   : > { %v3499_v26 = vadd.f32 %v3498_v24, %v3497_v23  ;;  %v3500_v27 = vpop.f32.mrb[18].mxu0  ;;  %v3520_v28 = vpop.f32.mrb[17].mxu1  ;;  %v3943_v23 = vld [vmem:[%s4412_s3 + $0x30] sm:$0xff] (!%p3291_p10)  }
 0x1ab   : > { %v3501_v29 = vpop.f32.mrb[19].mxu0  ;;  %v3521_v31 = vadd.f32 %v3520_v28, %v3519_v25  ;;  %v3522_v32 = vpop.f32.mrb[18].mxu1  ;;  %3635 = vmatpush3.bf16.msra.mxu0 (!%p3291_p10), %v3943_v23  ;;  %v3293_v28 = vld [vmem:[%s4413_s4] ss:$0 sm:$0xff] (!%p3291_p10) }
 0x1ac   : > { %v2639_v30 = vadd.f32 %v3499_v26, %v2598_v20  ;;  %v3502_v33 = vadd.f32 %v3501_v29, %v3500_v27  ;;  %v3523_v34 = vpop.f32.mrb[19].mxu1  ;;  %v3292_v20 = vld [vmem:[%s4411_s2] ss:$0 sm:$0xff] (!%p3291_p10)  ;;  %v3944_v26 = vld [vmem:[%s4412_s3 + $0x38] sm:$0xff] (!%p3291_p10)   ;;  %3636 = vmatprep.subr.bf16.mxu0 (!%p3291_p10), %v3970_v12 }
 0x1ad   : > { %v3524_v37 = vadd.f32 %v3523_v34, %v3522_v32 }
 0x1ae   : > { %v2680_v35 = vadd.f32 %v3521_v31, %v2639_v30  ;;  %v2642_v36 = vadd.f32 %v3502_v33, %v2601_v22 }
 0x1af   : > { %3637 = vmatpush3.bf16.msra.mxu0 (!%p3291_p10), %v3944_v26 }
 0x1b0   : > { %v2683_v38 = vadd.f32 %v3524_v37, %v2642_v36 }
 0x1c8   : > { %v3541_v39 = vpop.f32.mrb[20].mxu0 }
 0x1c9   : > { %v3563_v40 = vpop.f32.mrb[20].mxu1  ;;  %v3542_v41 = vpop.f32.mrb[21].mxu0 }
 0x1ca   : > { %v3543_v42 = vadd.f32 %v3542_v41, %v3541_v39  ;;  %v3564_v43 = vpop.f32.mrb[21].mxu1  ;;  %v3544_v44 = vpop.f32.mrb[22].mxu0 }
 0x1cb   : > { %v3565_v45 = vadd.f32 %v3564_v43, %v3563_v40  ;;  %v3566_v46 = vpop.f32.mrb[22].mxu1  ;;  %v3545_v47 = vpop.f32.mrb[23].mxu0 }
 0x1cc   : > { %v2721_v48 = vadd.f32 %v3543_v42, %v2680_v35  ;;  %v3546_v49 = vadd.f32 %v3545_v47, %v3544_v44  ;;  %v3567_v50 = vpop.f32.mrb[23].mxu1 }
 0x1cd   : > { %v3568_v51 = vadd.f32 %v3567_v50, %v3566_v46 }
 0x1ce   : > { %v2762_v52 = vadd.f32 %v3565_v45, %v2721_v48  ;;  %v2724_v53 = vadd.f32 %v3546_v49, %v2683_v38 }
 0x1d0   : > { %v2765_v54 = vadd.f32 %v3568_v51, %v2724_v53 }
 0x1e8   : > { %v3585_v55 = vpop.f32.mrb[24].mxu0 }
 0x1e9   : > { %v3607_v56 = vpop.f32.mrb[24].mxu1  ;;  %v3586_v57 = vpop.f32.mrb[25].mxu0 }
 0x1ea   : > { %v3587_v58 = vadd.f32 %v3586_v57, %v3585_v55  ;;  %v3608_v59 = vpop.f32.mrb[25].mxu1  ;;  %v3588_v60 = vpop.f32.mrb[26].mxu0 }
 0x1eb   : > { %v3609_v61 = vadd.f32 %v3608_v59, %v3607_v56  ;;  %v3610_v62 = vpop.f32.mrb[26].mxu1  ;;  %v3589_v63 = vpop.f32.mrb[27].mxu0 }
 0x1ec   : > { %v2803_v0 = vadd.f32 %v3587_v58, %v2762_v52  ;;  %v3590_v1 = vadd.f32 %v3589_v63, %v3588_v60  ;;  %v3611_v2 = vpop.f32.mrb[27].mxu1 }
 0x1ed   : > { %v3612_v4 = vadd.f32 %v3611_v2, %v3610_v62 }
 0x1ee   : > { %v2844_v5 = vadd.f32 %v3609_v61, %v2803_v0  ;;  %v2806_v6 = vadd.f32 %v3590_v1, %v2765_v54  ;;  %2857 = sbr.rel (%p3291_p10) target bundleno = 731 (0x2db), region = 71 }
 0x1f0   : > { %v2850_v8 = vadd.f32 %v2844_v5, %v314_v3  ;;  %v2847_v9 = vadd.f32 %v3612_v4, %v2806_v6 }
 0x1f2   : > { %2852 = vst [vmem:[#allocation2] sm:$0xff] %v2850_v8  ;;  %v2851_v10 = vadd.f32 %v2847_v9, %v315_v7 }
 0x1f4   : > { %2853 = vst [vmem:[#allocation2 + $0x8] sm:$0xff] %v2851_v10 }
 0x1f9   : > { %v2858_v18 = vld [vmem:[#allocation2] sm:$0xff] }
 0x1fa   : > { %v2867_v21 = vadd.f32 %v3292_v20, %v2858_v18 }
 0x1fb   : > { %v2859_v19 = vld [vmem:[#allocation2 + $0x8] sm:$0xff] }
 0x1fc   : > { %v2868_v22 = vadd.f32 %v3292_v20, %v2859_v19  ;;  %v2869_v24 = vmax.f32 %v2867_v21, 0.0 }
 0x1fe   : > { %v2870_v25 = vmax.f32 %v2868_v22, 0.0 }
 0x200   : > { %v2871_v27 = vpack.c.bf16 %v2870_v25, %v2869_v24 }
 0x202   : > { %3639 = vmatmul.mubr.bf16.vlgmr.msra.gmra.mrb[0].mxu0 %v2871_v27 }
 0x2d5   : > { %v2977_v29 = vpop.f32.mrb[0].mxu0 }
 0x2d6   : > { %v2978_v30 = vadd.f32 %v3293_v28, %v2977_v29  ;;  %v3640_v31 = vpop.f32.mrb[1].mxu0 }
 0x2d7   : > { %v2980_v32 = vpop.f32.mrb[2].mxu0 }
 0x2d8   : > { %2984 = vst [vmem:[%s4414_s5] sm:$0xff] %v2978_v30  ;;  %v2981_v33 = vadd.f32 %v3293_v28, %v2980_v32  ;;  %v3641_v34 = vpop.f32.mrb[3].mxu0 }
 0x2da   : > { %2985 = vst [vmem:[%s4414_s5 + $0x8] sm:$0xff] %v2981_v33 }
 0x2db PF: > { %p12_p11 = scmp.ge.s32.totalorder %s4021_s22, 16   ;;  %s4415_s18 = smov %s3963_s19 }
 0x2dc   : > { %s4416_s19 = smov %s4030_s25  ;;  %s4417_s20 = smov %s4021_s22 }
 0x2dd   :  { %14 = sbr.rel (!%p12_p11) target bundleno = 2 (0x2), region = 105 }

</bundles_post_ra>
